<compile_context>
chip_gen: v5e
topology: v5e:2x2
jax: 0.10.0
libtpu: 0.0.40
codegen_flags: <defaults>
</compile_context>

<pallas_src>
import math
import functools

import jax
import jax.numpy as jnp
from jax.experimental import pallas as pl
from jax.experimental.pallas import tpu as pltpu


# ----------------------------------------------------------------------------
# Kernel
# ----------------------------------------------------------------------------
def _mha_core(q_all, k_all, v_all, wp, bp, x_res, gamma, beta, *, n_head, eps):
    """Heads -> scores -> softmax -> PV -> concat -> out-proj -> +residual -> LN.

    q_all: (S, E) f32 (already scaled by 1/sqrt(D) via folded weights)
    k_all/v_all: (T, E) f32, wp: (E, E) bf16, bp/gamma/beta: (1, E) f32
    """
    S, E = q_all.shape
    D = E // n_head

    y_heads = []
    for h in range(n_head):                      # static unroll, H small
        lo, hi = h * D, (h + 1) * D
        qh = q_all[:, lo:hi].astype(jnp.bfloat16)           # (S, D)
        kh = k_all[:, lo:hi].astype(jnp.bfloat16)           # (T, D)
        vh = v_all[:, lo:hi].astype(jnp.bfloat16)           # (T, D)
        # scores: contract last dims directly (no explicit transpose)
        s = jax.lax.dot_general(qh, kh, (((1,), (1,)), ((), ())),
                                preferred_element_type=jnp.float32)   # (S, T)
        s = s - jnp.max(s, axis=-1, keepdims=True)
        p = jnp.exp(s)
        p = p / jnp.sum(p, axis=-1, keepdims=True)           # exact division (parity)
        y_heads.append(jnp.dot(p.astype(jnp.bfloat16), vh,
                               preferred_element_type=jnp.float32))   # (S, D)

    y = jnp.concatenate(y_heads, axis=-1)                     # (S, E)
    attn = jnp.dot(y.astype(jnp.bfloat16), wp,
                   preferred_element_type=jnp.float32) + bp   # (S, E)

    z = x_res + attn
    mean = jnp.mean(z, axis=-1, keepdims=True)
    var = jnp.mean((z - mean) ** 2, axis=-1, keepdims=True)   # biased variance
    return ((z - mean) * jax.lax.rsqrt(var + eps)) * gamma + beta


def _decoder_layer_kernel(tgt_ref, mem_ref,
                          wqkv_sa_ref, bqkv_sa_ref, wp_sa_ref, bp_sa_ref,
                          g1_ref, be1_ref,
                          wq_ca_ref, bq_ca_ref, wkv_ca_ref, bkv_ca_ref,
                          wp_ca_ref, bp_ca_ref, g2_ref, be2_ref,
                          w1_ref, b1_ref, w2_ref, b2_ref, g3_ref, be3_ref,
                          o_ref, *, n_head, eps):
    """One batch element of the full decoder layer (grid = (N,))."""
    E = tgt_ref.shape[-1]
    x = tgt_ref[0]                       # (S, E) f32
    m = mem_ref[0]                       # (T, E) f32

    # ---------------- self-attention + Add & LayerNorm (norm1) ----------------
    qkv = jnp.dot(x.astype(jnp.bfloat16), wqkv_sa_ref[...],
                  preferred_element_type=jnp.float32) + bqkv_sa_ref[...]   # (S, 3E)
    x = _mha_core(qkv[:, :E], qkv[:, E:2 * E], qkv[:, 2 * E:],
                  wp_sa_ref[...], bp_sa_ref[...], x,
                  g1_ref[...], be1_ref[...], n_head=n_head, eps=eps)

    # ---------------- cross-attention + Add & LayerNorm (norm2) ---------------
    q = jnp.dot(x.astype(jnp.bfloat16), wq_ca_ref[...],
                preferred_element_type=jnp.float32) + bq_ca_ref[...]       # (S, E)
    kv = jnp.dot(m.astype(jnp.bfloat16), wkv_ca_ref[...],
                 preferred_element_type=jnp.float32) + bkv_ca_ref[...]     # (T, 2E)
    x = _mha_core(q, kv[:, :E], kv[:, E:],
                  wp_ca_ref[...], bp_ca_ref[...], x,
                  g2_ref[...], be2_ref[...], n_head=n_head, eps=eps)

    # ---------------- FFN + Add & LayerNorm (norm3) ---------------------------
    h = jnp.dot(x.astype(jnp.bfloat16), w1_ref[...],
                preferred_element_type=jnp.float32) + b1_ref[...]          # (S, F)
    h = jnp.maximum(h, 0.0)
    y = jnp.dot(h.astype(jnp.bfloat16), w2_ref[...],
                preferred_element_type=jnp.float32) + b2_ref[...]          # (S, E)
    z = x + y
    mean = jnp.mean(z, axis=-1, keepdims=True)
    var = jnp.mean((z - mean) ** 2, axis=-1, keepdims=True)
    o_ref[0] = ((z - mean) * jax.lax.rsqrt(var + eps)) * g3_ref[...] + be3_ref[...]


# ----------------------------------------------------------------------------
# Wrapper (single pallas_call for the whole layer)
# ----------------------------------------------------------------------------
def transformer_decoder_layer(tgt, memory, params, n_head, eps=1e-5):
    N, S, E = tgt.shape
    _, T, _ = memory.shape
    F = params["w1"].shape[1]
    kern = functools.partial(_decoder_layer_kernel, n_head=n_head, eps=eps)

    flops = int(N * (
        2 * S * E * 3 * E                      # self qkv proj
        + 4 * S * S * E                        # self scores + PV (all heads)
        + 2 * S * E * E                        # self out proj
        + 2 * S * E * E + 4 * T * E * E        # cross q / kv proj
        + 4 * S * T * E                        # cross scores + PV
        + 2 * S * E * E                        # cross out proj
        + 4 * S * E * F                        # FFN
        + 30 * S * E))                         # residuals + 3 LayerNorms
    transcendentals = int(N * (n_head * S * (S + T) + 3 * S))
    bytes_accessed = int(4 * N * S * E * 2 + 4 * N * T * E
                         + 2 * (3 * E * E + 4 * E * E + 2 * E * E + 2 * E * F))
    cost = pl.CostEstimate(flops=flops, transcendentals=transcendentals,
                           bytes_accessed=bytes_accessed)

    def fullspec(shape):
        # grid-invariant (weights / biases / LN params) -- full block at (0, 0)
        return pl.BlockSpec(shape, lambda n: (0,) * len(shape))

    in_specs = [
        pl.BlockSpec((1, S, E), lambda n: (n, 0, 0)),      # tgt
        pl.BlockSpec((1, T, E), lambda n: (n, 0, 0)),      # memory
        fullspec((E, 3 * E)), fullspec((1, 3 * E)),        # wqkv_sa, bqkv_sa
        fullspec((E, E)), fullspec((1, E)),                # wp_sa, bp_sa
        fullspec((1, E)), fullspec((1, E)),                # gamma1, beta1
        fullspec((E, E)), fullspec((1, E)),                # wq_ca, bq_ca
        fullspec((E, 2 * E)), fullspec((1, 2 * E)),        # wkv_ca, bkv_ca
        fullspec((E, E)), fullspec((1, E)),                # wp_ca, bp_ca
        fullspec((1, E)), fullspec((1, E)),                # gamma2, beta2
        fullspec((E, F)), fullspec((1, F)),                # w1, b1
        fullspec((F, E)), fullspec((1, E)),                # w2, b2
        fullspec((1, E)), fullspec((1, E)),                # gamma3, beta3
    ]

    return pl.pallas_call(
        kern,
        out_shape=jax.ShapeDtypeStruct((N, S, E), jnp.float32),
        grid=(N,),
        in_specs=in_specs,
        out_specs=pl.BlockSpec((1, S, E), lambda n: (n, 0, 0)),
        compiler_params=pltpu.CompilerParams(
            dimension_semantics=("parallel",),        # N>=2 -> feeds both v7x TCs
            vmem_limit_bytes=32 * 1024 * 1024),
        cost_estimate=cost,
    )(tgt, memory,
      params["wqkv_sa"], params["bqkv_sa"], params["wp_sa"], params["bp_sa"],
      params["g1"], params["be1"],
      params["wq_ca"], params["bq_ca"], params["wkv_ca"], params["bkv_ca"],
      params["wp_ca"], params["bp_ca"], params["g2"], params["be2"],
      params["w1"], params["b1"], params["w2"], params["b2"],
      params["g3"], params["be3"])


# ----------------------------------------------------------------------------
# Parameter init (kernel layout: fused bf16 weights, (1,·) f32 biases/LN,
# softmax scale folded into Wq / bq)
# ----------------------------------------------------------------------------
def _linear_params(key, in_dim, out_dim):
    # PyTorch nn.Linear default: U(-1/sqrt(in), 1/sqrt(in)); stored (in, out).
    kw, kb = jax.random.split(key)
    bound = 1.0 / math.sqrt(in_dim)
    w = jax.random.uniform(kw, (in_dim, out_dim), jnp.float32, -bound, bound)
    b = jax.random.uniform(kb, (out_dim,), jnp.float32, -bound, bound)
    return w, b


def init_decoder_layer(key, input_dim, num_heads, dim_feedforward):
    E, F = input_dim, dim_feedforward
    D = E // num_heads
    scale = 1.0 / math.sqrt(D)
    keys = jax.random.split(key, 10)
    p = {}

    # ---- self-attention: fused (E, 3E) QKV, scale folded into the Q part ----
    wq, bq = _linear_params(keys[0], E, E)
    wk, bk = _linear_params(keys[1], E, E)
    wv, bv = _linear_params(keys[2], E, E)
    wp, bp = _linear_params(keys[3], E, E)
    p["wqkv_sa"] = jnp.concatenate([wq * scale, wk, wv], axis=1).astype(jnp.bfloat16)
    p["bqkv_sa"] = jnp.concatenate([bq * scale, bk, bv]).reshape(1, 3 * E)
    p["wp_sa"] = wp.astype(jnp.bfloat16)
    p["bp_sa"] = bp.reshape(1, E)

    # ---- cross-attention: Q (E,E) from tgt, fused KV (E, 2E) from memory ----
    wq, bq = _linear_params(keys[4], E, E)
    wk, bk = _linear_params(keys[5], E, E)
    wv, bv = _linear_params(keys[6], E, E)
    wp, bp = _linear_params(keys[7], E, E)
    p["wq_ca"] = (wq * scale).astype(jnp.bfloat16)
    p["bq_ca"] = (bq * scale).reshape(1, E)
    p["wkv_ca"] = jnp.concatenate([wk, wv], axis=1).astype(jnp.bfloat16)
    p["bkv_ca"] = jnp.concatenate([bk, bv]).reshape(1, 2 * E)
    p["wp_ca"] = wp.astype(jnp.bfloat16)
    p["bp_ca"] = bp.reshape(1, E)

    # ---- FFN ----
    w1, b1 = _linear_params(keys[8], E, F)
    w2, b2 = _linear_params(keys[9], F, E)
    p["w1"] = w1.astype(jnp.bfloat16)
    p["b1"] = b1.reshape(1, F)
    p["w2"] = w2.astype(jnp.bfloat16)
    p["b2"] = b2.reshape(1, E)

    # ---- LayerNorms ----
    for i in (1, 2, 3):
        p[f"g{i}"] = jnp.ones((1, E), jnp.float32)
        p[f"be{i}"] = jnp.zeros((1, E), jnp.float32)
    return p


# ----------------------------------------------------------------------------
if __name__ == "__main__":
    # Small but lane-dense demo shapes: E and FF are multiples of 128.
    N, S, T, E, H, FF = 2, 8, 8, 128, 4, 256

    key = jax.random.PRNGKey(0)
    k_tgt, k_mem, k_par = jax.random.split(key, 3)
    tgt = jax.random.normal(k_tgt, (N, S, E), jnp.float32)
    memory = jax.random.normal(k_mem, (N, T, E), jnp.float32)
    params = init_decoder_layer(k_par, E, H, FF)

    fwd = jax.jit(transformer_decoder_layer, static_argnames=("n_head",))
    out = fwd(tgt, memory, params, n_head=H)
    out = jax.block_until_ready(out)

    assert out.shape == (N, S, E)
    assert bool(jnp.all(jnp.isfinite(out)))
    print("KERNEL_OK")
</pallas_src>

<mosaic_0001>
module attributes {stable_mosaic.version = 11 : i64} {
  func.func @_decoder_layer_kernel(%arg0: i32, %arg1: memref<1x8x128xf32, #tpu.memory_space<vmem>>, %arg2: memref<1x8x128xf32, #tpu.memory_space<vmem>>, %arg3: memref<128x384xbf16, #tpu.memory_space<vmem>>, %arg4: memref<1x384xf32, #tpu.memory_space<vmem>>, %arg5: memref<128x128xbf16, #tpu.memory_space<vmem>>, %arg6: memref<1x128xf32, #tpu.memory_space<vmem>>, %arg7: memref<1x128xf32, #tpu.memory_space<vmem>>, %arg8: memref<1x128xf32, #tpu.memory_space<vmem>>, %arg9: memref<128x128xbf16, #tpu.memory_space<vmem>>, %arg10: memref<1x128xf32, #tpu.memory_space<vmem>>, %arg11: memref<128x256xbf16, #tpu.memory_space<vmem>>, %arg12: memref<1x256xf32, #tpu.memory_space<vmem>>, %arg13: memref<128x128xbf16, #tpu.memory_space<vmem>>, %arg14: memref<1x128xf32, #tpu.memory_space<vmem>>, %arg15: memref<1x128xf32, #tpu.memory_space<vmem>>, %arg16: memref<1x128xf32, #tpu.memory_space<vmem>>, %arg17: memref<128x256xbf16, #tpu.memory_space<vmem>>, %arg18: memref<1x256xf32, #tpu.memory_space<vmem>>, %arg19: memref<256x128xbf16, #tpu.memory_space<vmem>>, %arg20: memref<1x128xf32, #tpu.memory_space<vmem>>, %arg21: memref<1x128xf32, #tpu.memory_space<vmem>>, %arg22: memref<1x128xf32, #tpu.memory_space<vmem>>, %arg23: memref<1x8x128xf32, #tpu.memory_space<vmem>>) attributes {dimension_semantics = [#tpu.dimension_semantics<parallel>], iteration_bounds = array<i64: 2>, scalar_prefetch = 0 : i64, scratch_operands = 0 : i64, tpu.core_type = #tpu.core_type<tc>, window_params = [{transform_indices = @transform_0, window_bounds = array<i64: 1, 8, 128>}, {transform_indices = @transform_1, window_bounds = array<i64: 1, 8, 128>}, {pipeline_mode = #tpu.pipeline_mode<synchronous>, transform_indices = @transform_2, window_bounds = array<i64: 128, 384>}, {pipeline_mode = #tpu.pipeline_mode<synchronous>, transform_indices = @transform_3, window_bounds = array<i64: 1, 384>}, {pipeline_mode = #tpu.pipeline_mode<synchronous>, transform_indices = @transform_4, window_bounds = array<i64: 128, 128>}, {pipeline_mode = #tpu.pipeline_mode<synchronous>, transform_indices = @transform_5, window_bounds = array<i64: 1, 128>}, {pipeline_mode = #tpu.pipeline_mode<synchronous>, transform_indices = @transform_6, window_bounds = array<i64: 1, 128>}, {pipeline_mode = #tpu.pipeline_mode<synchronous>, transform_indices = @transform_7, window_bounds = array<i64: 1, 128>}, {pipeline_mode = #tpu.pipeline_mode<synchronous>, transform_indices = @transform_8, window_bounds = array<i64: 128, 128>}, {pipeline_mode = #tpu.pipeline_mode<synchronous>, transform_indices = @transform_9, window_bounds = array<i64: 1, 128>}, {pipeline_mode = #tpu.pipeline_mode<synchronous>, transform_indices = @transform_10, window_bounds = array<i64: 128, 256>}, {pipeline_mode = #tpu.pipeline_mode<synchronous>, transform_indices = @transform_11, window_bounds = array<i64: 1, 256>}, {pipeline_mode = #tpu.pipeline_mode<synchronous>, transform_indices = @transform_12, window_bounds = array<i64: 128, 128>}, {pipeline_mode = #tpu.pipeline_mode<synchronous>, transform_indices = @transform_13, window_bounds = array<i64: 1, 128>}, {pipeline_mode = #tpu.pipeline_mode<synchronous>, transform_indices = @transform_14, window_bounds = array<i64: 1, 128>}, {pipeline_mode = #tpu.pipeline_mode<synchronous>, transform_indices = @transform_15, window_bounds = array<i64: 1, 128>}, {pipeline_mode = #tpu.pipeline_mode<synchronous>, transform_indices = @transform_16, window_bounds = array<i64: 128, 256>}, {pipeline_mode = #tpu.pipeline_mode<synchronous>, transform_indices = @transform_17, window_bounds = array<i64: 1, 256>}, {pipeline_mode = #tpu.pipeline_mode<synchronous>, transform_indices = @transform_18, window_bounds = array<i64: 256, 128>}, {pipeline_mode = #tpu.pipeline_mode<synchronous>, transform_indices = @transform_19, window_bounds = array<i64: 1, 128>}, {pipeline_mode = #tpu.pipeline_mode<synchronous>, transform_indices = @transform_20, window_bounds = array<i64: 1, 128>}, {pipeline_mode = #tpu.pipeline_mode<synchronous>, transform_indices = @transform_21, window_bounds = array<i64: 1, 128>}, {transform_indices = @transform_22, window_bounds = array<i64: 1, 8, 128>}]} {
    %c0 = arith.constant 0 : index
    %c0_0 = arith.constant 0 : index
    %c0_1 = arith.constant 0 : index
    %0 = vector.load %arg1[%c0, %c0_0, %c0_1] : memref<1x8x128xf32, #tpu.memory_space<vmem>>, vector<1x8x128xf32>
    %1 = vector.shape_cast %0 : vector<1x8x128xf32> to vector<8x128xf32>
    %c0_2 = arith.constant 0 : index
    %c0_3 = arith.constant 0 : index
    %c0_4 = arith.constant 0 : index
    %2 = vector.load %arg2[%c0_2, %c0_3, %c0_4] : memref<1x8x128xf32, #tpu.memory_space<vmem>>, vector<1x8x128xf32>
    %3 = vector.shape_cast %2 : vector<1x8x128xf32> to vector<8x128xf32>
    %4 = arith.truncf %1 : vector<8x128xf32> to vector<8x128xbf16>
    %c0_5 = arith.constant 0 : index
    %c0_6 = arith.constant 0 : index
    %5 = vector.load %arg3[%c0_5, %c0_6] : memref<128x384xbf16, #tpu.memory_space<vmem>>, vector<128x384xbf16>
    %cst = arith.constant dense<0.000000e+00> : vector<8x384xf32>
    %6 = tpu.matmul %4, %5, %cst {dimension_numbers = #tpu.dot_dimension_numbers<[1], [0], [0], [1], [0, 0, 1, 1], [], []>} : vector<8x128xbf16>, vector<128x384xbf16>, vector<8x384xf32> -> vector<8x384xf32>
    %c0_7 = arith.constant 0 : index
    %c0_8 = arith.constant 0 : index
    %7 = vector.load %arg4[%c0_7, %c0_8] : memref<1x384xf32, #tpu.memory_space<vmem>>, vector<1x384xf32>
    %8 = vector.broadcast %7 : vector<1x384xf32> to vector<8x384xf32>
    %9 = arith.addf %6, %8 : vector<8x384xf32>
    %10 = vector.extract_strided_slice %9 {offsets = [0, 0], sizes = [8, 128], strides = [1, 1]} : vector<8x384xf32> to vector<8x128xf32>
    %11 = vector.extract_strided_slice %9 {offsets = [0, 128], sizes = [8, 128], strides = [1, 1]} : vector<8x384xf32> to vector<8x128xf32>
    %12 = vector.extract_strided_slice %9 {offsets = [0, 256], sizes = [8, 128], strides = [1, 1]} : vector<8x384xf32> to vector<8x128xf32>
    %c0_9 = arith.constant 0 : index
    %c0_10 = arith.constant 0 : index
    %13 = vector.load %arg5[%c0_9, %c0_10] : memref<128x128xbf16, #tpu.memory_space<vmem>>, vector<128x128xbf16>
    %c0_11 = arith.constant 0 : index
    %c0_12 = arith.constant 0 : index
    %14 = vector.load %arg6[%c0_11, %c0_12] : memref<1x128xf32, #tpu.memory_space<vmem>>, vector<1x128xf32>
    %c0_13 = arith.constant 0 : index
    %c0_14 = arith.constant 0 : index
    %15 = vector.load %arg7[%c0_13, %c0_14] : memref<1x128xf32, #tpu.memory_space<vmem>>, vector<1x128xf32>
    %c0_15 = arith.constant 0 : index
    %c0_16 = arith.constant 0 : index
    %16 = vector.load %arg8[%c0_15, %c0_16] : memref<1x128xf32, #tpu.memory_space<vmem>>, vector<1x128xf32>
    %17 = vector.extract_strided_slice %10 {offsets = [0, 0], sizes = [8, 32], strides = [1, 1]} : vector<8x128xf32> to vector<8x32xf32>
    %18 = arith.truncf %17 : vector<8x32xf32> to vector<8x32xbf16>
    %19 = vector.extract_strided_slice %11 {offsets = [0, 0], sizes = [8, 32], strides = [1, 1]} : vector<8x128xf32> to vector<8x32xf32>
    %20 = arith.truncf %19 : vector<8x32xf32> to vector<8x32xbf16>
    %21 = vector.extract_strided_slice %12 {offsets = [0, 0], sizes = [8, 32], strides = [1, 1]} : vector<8x128xf32> to vector<8x32xf32>
    %22 = arith.truncf %21 : vector<8x32xf32> to vector<8x32xbf16>
    %cst_17 = arith.constant dense<0.000000e+00> : vector<8x8xf32>
    %23 = tpu.matmul %18, %20, %cst_17 {dimension_numbers = #tpu.dot_dimension_numbers<[1], [1], [0], [0], [0, 0, 1, 0], [], []>} : vector<8x32xbf16>, vector<8x32xbf16>, vector<8x8xf32> -> vector<8x8xf32>
    %cst_18 = arith.constant dense<0xFF800000> : vector<8xf32>
    %24 = vector.multi_reduction <maximumf>, %23, %cst_18 [1] : vector<8x8xf32> to vector<8xf32>
    %25 = vector.shape_cast %24 : vector<8xf32> to vector<8x1xf32>
    %26 = vector.broadcast %25 : vector<8x1xf32> to vector<8x8xf32>
    %27 = arith.subf %23, %26 : vector<8x8xf32>
    %28 = math.exp %27 : vector<8x8xf32>
    %cst_19 = arith.constant dense<0.000000e+00> : vector<8xf32>
    %29 = vector.multi_reduction <add>, %28, %cst_19 [1] : vector<8x8xf32> to vector<8xf32>
    %30 = vector.shape_cast %29 : vector<8xf32> to vector<8x1xf32>
    %31 = vector.broadcast %30 : vector<8x1xf32> to vector<8x8xf32>
    %32 = arith.divf %28, %31 : vector<8x8xf32>
    %33 = arith.truncf %32 : vector<8x8xf32> to vector<8x8xbf16>
    %cst_20 = arith.constant dense<0.000000e+00> : vector<8x32xf32>
    %34 = tpu.matmul %33, %22, %cst_20 {dimension_numbers = #tpu.dot_dimension_numbers<[1], [0], [0], [1], [0, 0, 1, 1], [], []>} : vector<8x8xbf16>, vector<8x32xbf16>, vector<8x32xf32> -> vector<8x32xf32>
    %35 = vector.extract_strided_slice %10 {offsets = [0, 32], sizes = [8, 32], strides = [1, 1]} : vector<8x128xf32> to vector<8x32xf32>
    %36 = arith.truncf %35 : vector<8x32xf32> to vector<8x32xbf16>
    %37 = vector.extract_strided_slice %11 {offsets = [0, 32], sizes = [8, 32], strides = [1, 1]} : vector<8x128xf32> to vector<8x32xf32>
    %38 = arith.truncf %37 : vector<8x32xf32> to vector<8x32xbf16>
    %39 = vector.extract_strided_slice %12 {offsets = [0, 32], sizes = [8, 32], strides = [1, 1]} : vector<8x128xf32> to vector<8x32xf32>
    %40 = arith.truncf %39 : vector<8x32xf32> to vector<8x32xbf16>
    %cst_21 = arith.constant dense<0.000000e+00> : vector<8x8xf32>
    %41 = tpu.matmul %36, %38, %cst_21 {dimension_numbers = #tpu.dot_dimension_numbers<[1], [1], [0], [0], [0, 0, 1, 0], [], []>} : vector<8x32xbf16>, vector<8x32xbf16>, vector<8x8xf32> -> vector<8x8xf32>
    %cst_22 = arith.constant dense<0xFF800000> : vector<8xf32>
    %42 = vector.multi_reduction <maximumf>, %41, %cst_22 [1] : vector<8x8xf32> to vector<8xf32>
    %43 = vector.shape_cast %42 : vector<8xf32> to vector<8x1xf32>
    %44 = vector.broadcast %43 : vector<8x1xf32> to vector<8x8xf32>
    %45 = arith.subf %41, %44 : vector<8x8xf32>
    %46 = math.exp %45 : vector<8x8xf32>
    %cst_23 = arith.constant dense<0.000000e+00> : vector<8xf32>
    %47 = vector.multi_reduction <add>, %46, %cst_23 [1] : vector<8x8xf32> to vector<8xf32>
    %48 = vector.shape_cast %47 : vector<8xf32> to vector<8x1xf32>
    %49 = vector.broadcast %48 : vector<8x1xf32> to vector<8x8xf32>
    %50 = arith.divf %46, %49 : vector<8x8xf32>
    %51 = arith.truncf %50 : vector<8x8xf32> to vector<8x8xbf16>
    %cst_24 = arith.constant dense<0.000000e+00> : vector<8x32xf32>
    %52 = tpu.matmul %51, %40, %cst_24 {dimension_numbers = #tpu.dot_dimension_numbers<[1], [0], [0], [1], [0, 0, 1, 1], [], []>} : vector<8x8xbf16>, vector<8x32xbf16>, vector<8x32xf32> -> vector<8x32xf32>
    %53 = vector.extract_strided_slice %10 {offsets = [0, 64], sizes = [8, 32], strides = [1, 1]} : vector<8x128xf32> to vector<8x32xf32>
    %54 = arith.truncf %53 : vector<8x32xf32> to vector<8x32xbf16>
    %55 = vector.extract_strided_slice %11 {offsets = [0, 64], sizes = [8, 32], strides = [1, 1]} : vector<8x128xf32> to vector<8x32xf32>
    %56 = arith.truncf %55 : vector<8x32xf32> to vector<8x32xbf16>
    %57 = vector.extract_strided_slice %12 {offsets = [0, 64], sizes = [8, 32], strides = [1, 1]} : vector<8x128xf32> to vector<8x32xf32>
    %58 = arith.truncf %57 : vector<8x32xf32> to vector<8x32xbf16>
    %cst_25 = arith.constant dense<0.000000e+00> : vector<8x8xf32>
    %59 = tpu.matmul %54, %56, %cst_25 {dimension_numbers = #tpu.dot_dimension_numbers<[1], [1], [0], [0], [0, 0, 1, 0], [], []>} : vector<8x32xbf16>, vector<8x32xbf16>, vector<8x8xf32> -> vector<8x8xf32>
    %cst_26 = arith.constant dense<0xFF800000> : vector<8xf32>
    %60 = vector.multi_reduction <maximumf>, %59, %cst_26 [1] : vector<8x8xf32> to vector<8xf32>
    %61 = vector.shape_cast %60 : vector<8xf32> to vector<8x1xf32>
    %62 = vector.broadcast %61 : vector<8x1xf32> to vector<8x8xf32>
    %63 = arith.subf %59, %62 : vector<8x8xf32>
    %64 = math.exp %63 : vector<8x8xf32>
    %cst_27 = arith.constant dense<0.000000e+00> : vector<8xf32>
    %65 = vector.multi_reduction <add>, %64, %cst_27 [1] : vector<8x8xf32> to vector<8xf32>
    %66 = vector.shape_cast %65 : vector<8xf32> to vector<8x1xf32>
    %67 = vector.broadcast %66 : vector<8x1xf32> to vector<8x8xf32>
    %68 = arith.divf %64, %67 : vector<8x8xf32>
    %69 = arith.truncf %68 : vector<8x8xf32> to vector<8x8xbf16>
    %cst_28 = arith.constant dense<0.000000e+00> : vector<8x32xf32>
    %70 = tpu.matmul %69, %58, %cst_28 {dimension_numbers = #tpu.dot_dimension_numbers<[1], [0], [0], [1], [0, 0, 1, 1], [], []>} : vector<8x8xbf16>, vector<8x32xbf16>, vector<8x32xf32> -> vector<8x32xf32>
    %71 = vector.extract_strided_slice %10 {offsets = [0, 96], sizes = [8, 32], strides = [1, 1]} : vector<8x128xf32> to vector<8x32xf32>
    %72 = arith.truncf %71 : vector<8x32xf32> to vector<8x32xbf16>
    %73 = vector.extract_strided_slice %11 {offsets = [0, 96], sizes = [8, 32], strides = [1, 1]} : vector<8x128xf32> to vector<8x32xf32>
    %74 = arith.truncf %73 : vector<8x32xf32> to vector<8x32xbf16>
    %75 = vector.extract_strided_slice %12 {offsets = [0, 96], sizes = [8, 32], strides = [1, 1]} : vector<8x128xf32> to vector<8x32xf32>
    %76 = arith.truncf %75 : vector<8x32xf32> to vector<8x32xbf16>
    %cst_29 = arith.constant dense<0.000000e+00> : vector<8x8xf32>
    %77 = tpu.matmul %72, %74, %cst_29 {dimension_numbers = #tpu.dot_dimension_numbers<[1], [1], [0], [0], [0, 0, 1, 0], [], []>} : vector<8x32xbf16>, vector<8x32xbf16>, vector<8x8xf32> -> vector<8x8xf32>
    %cst_30 = arith.constant dense<0xFF800000> : vector<8xf32>
    %78 = vector.multi_reduction <maximumf>, %77, %cst_30 [1] : vector<8x8xf32> to vector<8xf32>
    %79 = vector.shape_cast %78 : vector<8xf32> to vector<8x1xf32>
    %80 = vector.broadcast %79 : vector<8x1xf32> to vector<8x8xf32>
    %81 = arith.subf %77, %80 : vector<8x8xf32>
    %82 = math.exp %81 : vector<8x8xf32>
    %cst_31 = arith.constant dense<0.000000e+00> : vector<8xf32>
    %83 = vector.multi_reduction <add>, %82, %cst_31 [1] : vector<8x8xf32> to vector<8xf32>
    %84 = vector.shape_cast %83 : vector<8xf32> to vector<8x1xf32>
    %85 = vector.broadcast %84 : vector<8x1xf32> to vector<8x8xf32>
    %86 = arith.divf %82, %85 : vector<8x8xf32>
    %87 = arith.truncf %86 : vector<8x8xf32> to vector<8x8xbf16>
    %cst_32 = arith.constant dense<0.000000e+00> : vector<8x32xf32>
    %88 = tpu.matmul %87, %76, %cst_32 {dimension_numbers = #tpu.dot_dimension_numbers<[1], [0], [0], [1], [0, 0, 1, 1], [], []>} : vector<8x8xbf16>, vector<8x32xbf16>, vector<8x32xf32> -> vector<8x32xf32>
    %89 = tpu.concatenate %34, %52, %70, %88 in 1 : vector<8x32xf32>, vector<8x32xf32>, vector<8x32xf32>, vector<8x32xf32> -> vector<8x128xf32>
    %90 = arith.truncf %89 : vector<8x128xf32> to vector<8x128xbf16>
    %cst_33 = arith.constant dense<0.000000e+00> : vector<8x128xf32>
    %91 = tpu.matmul %90, %13, %cst_33 {dimension_numbers = #tpu.dot_dimension_numbers<[1], [0], [0], [1], [0, 0, 1, 1], [], []>} : vector<8x128xbf16>, vector<128x128xbf16>, vector<8x128xf32> -> vector<8x128xf32>
    %92 = vector.broadcast %14 : vector<1x128xf32> to vector<8x128xf32>
    %93 = arith.addf %91, %92 : vector<8x128xf32>
    %94 = arith.addf %1, %93 : vector<8x128xf32>
    %cst_34 = arith.constant dense<0.000000e+00> : vector<8xf32>
    %95 = vector.multi_reduction <add>, %94, %cst_34 [1] : vector<8x128xf32> to vector<8xf32>
    %96 = vector.shape_cast %95 : vector<8xf32> to vector<8x1xf32>
    %cst_35 = arith.constant 1.280000e+02 : f32
    %97 = vector.broadcast %cst_35 : f32 to vector<8x1xf32>
    %98 = arith.divf %96, %97 : vector<8x1xf32>
    %99 = vector.broadcast %98 : vector<8x1xf32> to vector<8x128xf32>
    %100 = arith.subf %94, %99 : vector<8x128xf32>
    %101 = arith.mulf %100, %100 : vector<8x128xf32>
    %cst_36 = arith.constant dense<0.000000e+00> : vector<8xf32>
    %102 = vector.multi_reduction <add>, %101, %cst_36 [1] : vector<8x128xf32> to vector<8xf32>
    %103 = vector.shape_cast %102 : vector<8xf32> to vector<8x1xf32>
    %cst_37 = arith.constant 1.280000e+02 : f32
    %104 = vector.broadcast %cst_37 : f32 to vector<8x1xf32>
    %105 = arith.divf %103, %104 : vector<8x1xf32>
    %106 = vector.broadcast %98 : vector<8x1xf32> to vector<8x128xf32>
    %107 = arith.subf %94, %106 : vector<8x128xf32>
    %cst_38 = arith.constant 9.99999974E-6 : f32
    %108 = vector.broadcast %cst_38 : f32 to vector<8x1xf32>
    %109 = arith.addf %105, %108 : vector<8x1xf32>
    %110 = math.rsqrt %109 : vector<8x1xf32>
    %111 = vector.broadcast %110 : vector<8x1xf32> to vector<8x128xf32>
    %112 = arith.mulf %107, %111 : vector<8x128xf32>
    %113 = vector.broadcast %15 : vector<1x128xf32> to vector<8x128xf32>
    %114 = arith.mulf %112, %113 : vector<8x128xf32>
    %115 = vector.broadcast %16 : vector<1x128xf32> to vector<8x128xf32>
    %116 = arith.addf %114, %115 : vector<8x128xf32>
    %117 = arith.truncf %116 : vector<8x128xf32> to vector<8x128xbf16>
    %c0_39 = arith.constant 0 : index
    %c0_40 = arith.constant 0 : index
    %118 = vector.load %arg9[%c0_39, %c0_40] : memref<128x128xbf16, #tpu.memory_space<vmem>>, vector<128x128xbf16>
    %cst_41 = arith.constant dense<0.000000e+00> : vector<8x128xf32>
    %119 = tpu.matmul %117, %118, %cst_41 {dimension_numbers = #tpu.dot_dimension_numbers<[1], [0], [0], [1], [0, 0, 1, 1], [], []>} : vector<8x128xbf16>, vector<128x128xbf16>, vector<8x128xf32> -> vector<8x128xf32>
    %c0_42 = arith.constant 0 : index
    %c0_43 = arith.constant 0 : index
    %120 = vector.load %arg10[%c0_42, %c0_43] : memref<1x128xf32, #tpu.memory_space<vmem>>, vector<1x128xf32>
    %121 = vector.broadcast %120 : vector<1x128xf32> to vector<8x128xf32>
    %122 = arith.addf %119, %121 : vector<8x128xf32>
    %123 = arith.truncf %3 : vector<8x128xf32> to vector<8x128xbf16>
    %c0_44 = arith.constant 0 : index
    %c0_45 = arith.constant 0 : index
    %124 = vector.load %arg11[%c0_44, %c0_45] : memref<128x256xbf16, #tpu.memory_space<vmem>>, vector<128x256xbf16>
    %cst_46 = arith.constant dense<0.000000e+00> : vector<8x256xf32>
    %125 = tpu.matmul %123, %124, %cst_46 {dimension_numbers = #tpu.dot_dimension_numbers<[1], [0], [0], [1], [0, 0, 1, 1], [], []>} : vector<8x128xbf16>, vector<128x256xbf16>, vector<8x256xf32> -> vector<8x256xf32>
    %c0_47 = arith.constant 0 : index
    %c0_48 = arith.constant 0 : index
    %126 = vector.load %arg12[%c0_47, %c0_48] : memref<1x256xf32, #tpu.memory_space<vmem>>, vector<1x256xf32>
    %127 = vector.broadcast %126 : vector<1x256xf32> to vector<8x256xf32>
    %128 = arith.addf %125, %127 : vector<8x256xf32>
    %129 = vector.extract_strided_slice %128 {offsets = [0, 0], sizes = [8, 128], strides = [1, 1]} : vector<8x256xf32> to vector<8x128xf32>
    %130 = vector.extract_strided_slice %128 {offsets = [0, 128], sizes = [8, 128], strides = [1, 1]} : vector<8x256xf32> to vector<8x128xf32>
    %c0_49 = arith.constant 0 : index
    %c0_50 = arith.constant 0 : index
    %131 = vector.load %arg13[%c0_49, %c0_50] : memref<128x128xbf16, #tpu.memory_space<vmem>>, vector<128x128xbf16>
    %c0_51 = arith.constant 0 : index
    %c0_52 = arith.constant 0 : index
    %132 = vector.load %arg14[%c0_51, %c0_52] : memref<1x128xf32, #tpu.memory_space<vmem>>, vector<1x128xf32>
    %c0_53 = arith.constant 0 : index
    %c0_54 = arith.constant 0 : index
    %133 = vector.load %arg15[%c0_53, %c0_54] : memref<1x128xf32, #tpu.memory_space<vmem>>, vector<1x128xf32>
    %c0_55 = arith.constant 0 : index
    %c0_56 = arith.constant 0 : index
    %134 = vector.load %arg16[%c0_55, %c0_56] : memref<1x128xf32, #tpu.memory_space<vmem>>, vector<1x128xf32>
    %135 = vector.extract_strided_slice %122 {offsets = [0, 0], sizes = [8, 32], strides = [1, 1]} : vector<8x128xf32> to vector<8x32xf32>
    %136 = arith.truncf %135 : vector<8x32xf32> to vector<8x32xbf16>
    %137 = vector.extract_strided_slice %129 {offsets = [0, 0], sizes = [8, 32], strides = [1, 1]} : vector<8x128xf32> to vector<8x32xf32>
    %138 = arith.truncf %137 : vector<8x32xf32> to vector<8x32xbf16>
    %139 = vector.extract_strided_slice %130 {offsets = [0, 0], sizes = [8, 32], strides = [1, 1]} : vector<8x128xf32> to vector<8x32xf32>
    %140 = arith.truncf %139 : vector<8x32xf32> to vector<8x32xbf16>
    %cst_57 = arith.constant dense<0.000000e+00> : vector<8x8xf32>
    %141 = tpu.matmul %136, %138, %cst_57 {dimension_numbers = #tpu.dot_dimension_numbers<[1], [1], [0], [0], [0, 0, 1, 0], [], []>} : vector<8x32xbf16>, vector<8x32xbf16>, vector<8x8xf32> -> vector<8x8xf32>
    %cst_58 = arith.constant dense<0xFF800000> : vector<8xf32>
    %142 = vector.multi_reduction <maximumf>, %141, %cst_58 [1] : vector<8x8xf32> to vector<8xf32>
    %143 = vector.shape_cast %142 : vector<8xf32> to vector<8x1xf32>
    %144 = vector.broadcast %143 : vector<8x1xf32> to vector<8x8xf32>
    %145 = arith.subf %141, %144 : vector<8x8xf32>
    %146 = math.exp %145 : vector<8x8xf32>
    %cst_59 = arith.constant dense<0.000000e+00> : vector<8xf32>
    %147 = vector.multi_reduction <add>, %146, %cst_59 [1] : vector<8x8xf32> to vector<8xf32>
    %148 = vector.shape_cast %147 : vector<8xf32> to vector<8x1xf32>
    %149 = vector.broadcast %148 : vector<8x1xf32> to vector<8x8xf32>
    %150 = arith.divf %146, %149 : vector<8x8xf32>
    %151 = arith.truncf %150 : vector<8x8xf32> to vector<8x8xbf16>
    %cst_60 = arith.constant dense<0.000000e+00> : vector<8x32xf32>
    %152 = tpu.matmul %151, %140, %cst_60 {dimension_numbers = #tpu.dot_dimension_numbers<[1], [0], [0], [1], [0, 0, 1, 1], [], []>} : vector<8x8xbf16>, vector<8x32xbf16>, vector<8x32xf32> -> vector<8x32xf32>
    %153 = vector.extract_strided_slice %122 {offsets = [0, 32], sizes = [8, 32], strides = [1, 1]} : vector<8x128xf32> to vector<8x32xf32>
    %154 = arith.truncf %153 : vector<8x32xf32> to vector<8x32xbf16>
    %155 = vector.extract_strided_slice %129 {offsets = [0, 32], sizes = [8, 32], strides = [1, 1]} : vector<8x128xf32> to vector<8x32xf32>
    %156 = arith.truncf %155 : vector<8x32xf32> to vector<8x32xbf16>
    %157 = vector.extract_strided_slice %130 {offsets = [0, 32], sizes = [8, 32], strides = [1, 1]} : vector<8x128xf32> to vector<8x32xf32>
    %158 = arith.truncf %157 : vector<8x32xf32> to vector<8x32xbf16>
    %cst_61 = arith.constant dense<0.000000e+00> : vector<8x8xf32>
    %159 = tpu.matmul %154, %156, %cst_61 {dimension_numbers = #tpu.dot_dimension_numbers<[1], [1], [0], [0], [0, 0, 1, 0], [], []>} : vector<8x32xbf16>, vector<8x32xbf16>, vector<8x8xf32> -> vector<8x8xf32>
    %cst_62 = arith.constant dense<0xFF800000> : vector<8xf32>
    %160 = vector.multi_reduction <maximumf>, %159, %cst_62 [1] : vector<8x8xf32> to vector<8xf32>
    %161 = vector.shape_cast %160 : vector<8xf32> to vector<8x1xf32>
    %162 = vector.broadcast %161 : vector<8x1xf32> to vector<8x8xf32>
    %163 = arith.subf %159, %162 : vector<8x8xf32>
    %164 = math.exp %163 : vector<8x8xf32>
    %cst_63 = arith.constant dense<0.000000e+00> : vector<8xf32>
    %165 = vector.multi_reduction <add>, %164, %cst_63 [1] : vector<8x8xf32> to vector<8xf32>
    %166 = vector.shape_cast %165 : vector<8xf32> to vector<8x1xf32>
    %167 = vector.broadcast %166 : vector<8x1xf32> to vector<8x8xf32>
    %168 = arith.divf %164, %167 : vector<8x8xf32>
    %169 = arith.truncf %168 : vector<8x8xf32> to vector<8x8xbf16>
    %cst_64 = arith.constant dense<0.000000e+00> : vector<8x32xf32>
    %170 = tpu.matmul %169, %158, %cst_64 {dimension_numbers = #tpu.dot_dimension_numbers<[1], [0], [0], [1], [0, 0, 1, 1], [], []>} : vector<8x8xbf16>, vector<8x32xbf16>, vector<8x32xf32> -> vector<8x32xf32>
    %171 = vector.extract_strided_slice %122 {offsets = [0, 64], sizes = [8, 32], strides = [1, 1]} : vector<8x128xf32> to vector<8x32xf32>
    %172 = arith.truncf %171 : vector<8x32xf32> to vector<8x32xbf16>
    %173 = vector.extract_strided_slice %129 {offsets = [0, 64], sizes = [8, 32], strides = [1, 1]} : vector<8x128xf32> to vector<8x32xf32>
    %174 = arith.truncf %173 : vector<8x32xf32> to vector<8x32xbf16>
    %175 = vector.extract_strided_slice %130 {offsets = [0, 64], sizes = [8, 32], strides = [1, 1]} : vector<8x128xf32> to vector<8x32xf32>
    %176 = arith.truncf %175 : vector<8x32xf32> to vector<8x32xbf16>
    %cst_65 = arith.constant dense<0.000000e+00> : vector<8x8xf32>
    %177 = tpu.matmul %172, %174, %cst_65 {dimension_numbers = #tpu.dot_dimension_numbers<[1], [1], [0], [0], [0, 0, 1, 0], [], []>} : vector<8x32xbf16>, vector<8x32xbf16>, vector<8x8xf32> -> vector<8x8xf32>
    %cst_66 = arith.constant dense<0xFF800000> : vector<8xf32>
    %178 = vector.multi_reduction <maximumf>, %177, %cst_66 [1] : vector<8x8xf32> to vector<8xf32>
    %179 = vector.shape_cast %178 : vector<8xf32> to vector<8x1xf32>
    %180 = vector.broadcast %179 : vector<8x1xf32> to vector<8x8xf32>
    %181 = arith.subf %177, %180 : vector<8x8xf32>
    %182 = math.exp %181 : vector<8x8xf32>
    %cst_67 = arith.constant dense<0.000000e+00> : vector<8xf32>
    %183 = vector.multi_reduction <add>, %182, %cst_67 [1] : vector<8x8xf32> to vector<8xf32>
    %184 = vector.shape_cast %183 : vector<8xf32> to vector<8x1xf32>
    %185 = vector.broadcast %184 : vector<8x1xf32> to vector<8x8xf32>
    %186 = arith.divf %182, %185 : vector<8x8xf32>
    %187 = arith.truncf %186 : vector<8x8xf32> to vector<8x8xbf16>
    %cst_68 = arith.constant dense<0.000000e+00> : vector<8x32xf32>
    %188 = tpu.matmul %187, %176, %cst_68 {dimension_numbers = #tpu.dot_dimension_numbers<[1], [0], [0], [1], [0, 0, 1, 1], [], []>} : vector<8x8xbf16>, vector<8x32xbf16>, vector<8x32xf32> -> vector<8x32xf32>
    %189 = vector.extract_strided_slice %122 {offsets = [0, 96], sizes = [8, 32], strides = [1, 1]} : vector<8x128xf32> to vector<8x32xf32>
    %190 = arith.truncf %189 : vector<8x32xf32> to vector<8x32xbf16>
    %191 = vector.extract_strided_slice %129 {offsets = [0, 96], sizes = [8, 32], strides = [1, 1]} : vector<8x128xf32> to vector<8x32xf32>
    %192 = arith.truncf %191 : vector<8x32xf32> to vector<8x32xbf16>
    %193 = vector.extract_strided_slice %130 {offsets = [0, 96], sizes = [8, 32], strides = [1, 1]} : vector<8x128xf32> to vector<8x32xf32>
    %194 = arith.truncf %193 : vector<8x32xf32> to vector<8x32xbf16>
    %cst_69 = arith.constant dense<0.000000e+00> : vector<8x8xf32>
    %195 = tpu.matmul %190, %192, %cst_69 {dimension_numbers = #tpu.dot_dimension_numbers<[1], [1], [0], [0], [0, 0, 1, 0], [], []>} : vector<8x32xbf16>, vector<8x32xbf16>, vector<8x8xf32> -> vector<8x8xf32>
    %cst_70 = arith.constant dense<0xFF800000> : vector<8xf32>
    %196 = vector.multi_reduction <maximumf>, %195, %cst_70 [1] : vector<8x8xf32> to vector<8xf32>
    %197 = vector.shape_cast %196 : vector<8xf32> to vector<8x1xf32>
    %198 = vector.broadcast %197 : vector<8x1xf32> to vector<8x8xf32>
    %199 = arith.subf %195, %198 : vector<8x8xf32>
    %200 = math.exp %199 : vector<8x8xf32>
    %cst_71 = arith.constant dense<0.000000e+00> : vector<8xf32>
    %201 = vector.multi_reduction <add>, %200, %cst_71 [1] : vector<8x8xf32> to vector<8xf32>
    %202 = vector.shape_cast %201 : vector<8xf32> to vector<8x1xf32>
    %203 = vector.broadcast %202 : vector<8x1xf32> to vector<8x8xf32>
    %204 = arith.divf %200, %203 : vector<8x8xf32>
    %205 = arith.truncf %204 : vector<8x8xf32> to vector<8x8xbf16>
    %cst_72 = arith.constant dense<0.000000e+00> : vector<8x32xf32>
    %206 = tpu.matmul %205, %194, %cst_72 {dimension_numbers = #tpu.dot_dimension_numbers<[1], [0], [0], [1], [0, 0, 1, 1], [], []>} : vector<8x8xbf16>, vector<8x32xbf16>, vector<8x32xf32> -> vector<8x32xf32>
    %207 = tpu.concatenate %152, %170, %188, %206 in 1 : vector<8x32xf32>, vector<8x32xf32>, vector<8x32xf32>, vector<8x32xf32> -> vector<8x128xf32>
    %208 = arith.truncf %207 : vector<8x128xf32> to vector<8x128xbf16>
    %cst_73 = arith.constant dense<0.000000e+00> : vector<8x128xf32>
    %209 = tpu.matmul %208, %131, %cst_73 {dimension_numbers = #tpu.dot_dimension_numbers<[1], [0], [0], [1], [0, 0, 1, 1], [], []>} : vector<8x128xbf16>, vector<128x128xbf16>, vector<8x128xf32> -> vector<8x128xf32>
    %210 = vector.broadcast %132 : vector<1x128xf32> to vector<8x128xf32>
    %211 = arith.addf %209, %210 : vector<8x128xf32>
    %212 = arith.addf %116, %211 : vector<8x128xf32>
    %cst_74 = arith.constant dense<0.000000e+00> : vector<8xf32>
    %213 = vector.multi_reduction <add>, %212, %cst_74 [1] : vector<8x128xf32> to vector<8xf32>
    %214 = vector.shape_cast %213 : vector<8xf32> to vector<8x1xf32>
    %cst_75 = arith.constant 1.280000e+02 : f32
    %215 = vector.broadcast %cst_75 : f32 to vector<8x1xf32>
    %216 = arith.divf %214, %215 : vector<8x1xf32>
    %217 = vector.broadcast %216 : vector<8x1xf32> to vector<8x128xf32>
    %218 = arith.subf %212, %217 : vector<8x128xf32>
    %219 = arith.mulf %218, %218 : vector<8x128xf32>
    %cst_76 = arith.constant dense<0.000000e+00> : vector<8xf32>
    %220 = vector.multi_reduction <add>, %219, %cst_76 [1] : vector<8x128xf32> to vector<8xf32>
    %221 = vector.shape_cast %220 : vector<8xf32> to vector<8x1xf32>
    %cst_77 = arith.constant 1.280000e+02 : f32
    %222 = vector.broadcast %cst_77 : f32 to vector<8x1xf32>
    %223 = arith.divf %221, %222 : vector<8x1xf32>
    %224 = vector.broadcast %216 : vector<8x1xf32> to vector<8x128xf32>
    %225 = arith.subf %212, %224 : vector<8x128xf32>
    %cst_78 = arith.constant 9.99999974E-6 : f32
    %226 = vector.broadcast %cst_78 : f32 to vector<8x1xf32>
    %227 = arith.addf %223, %226 : vector<8x1xf32>
    %228 = math.rsqrt %227 : vector<8x1xf32>
    %229 = vector.broadcast %228 : vector<8x1xf32> to vector<8x128xf32>
    %230 = arith.mulf %225, %229 : vector<8x128xf32>
    %231 = vector.broadcast %133 : vector<1x128xf32> to vector<8x128xf32>
    %232 = arith.mulf %230, %231 : vector<8x128xf32>
    %233 = vector.broadcast %134 : vector<1x128xf32> to vector<8x128xf32>
    %234 = arith.addf %232, %233 : vector<8x128xf32>
    %235 = arith.truncf %234 : vector<8x128xf32> to vector<8x128xbf16>
    %c0_79 = arith.constant 0 : index
    %c0_80 = arith.constant 0 : index
    %236 = vector.load %arg17[%c0_79, %c0_80] : memref<128x256xbf16, #tpu.memory_space<vmem>>, vector<128x256xbf16>
    %cst_81 = arith.constant dense<0.000000e+00> : vector<8x256xf32>
    %237 = tpu.matmul %235, %236, %cst_81 {dimension_numbers = #tpu.dot_dimension_numbers<[1], [0], [0], [1], [0, 0, 1, 1], [], []>} : vector<8x128xbf16>, vector<128x256xbf16>, vector<8x256xf32> -> vector<8x256xf32>
    %c0_82 = arith.constant 0 : index
    %c0_83 = arith.constant 0 : index
    %238 = vector.load %arg18[%c0_82, %c0_83] : memref<1x256xf32, #tpu.memory_space<vmem>>, vector<1x256xf32>
    %239 = vector.broadcast %238 : vector<1x256xf32> to vector<8x256xf32>
    %240 = arith.addf %237, %239 : vector<8x256xf32>
    %cst_84 = arith.constant 0.000000e+00 : f32
    %241 = vector.broadcast %cst_84 : f32 to vector<8x256xf32>
    %242 = arith.maximumf %240, %241 : vector<8x256xf32>
    %243 = arith.truncf %242 : vector<8x256xf32> to vector<8x256xbf16>
    %c0_85 = arith.constant 0 : index
    %c0_86 = arith.constant 0 : index
    %244 = vector.load %arg19[%c0_85, %c0_86] : memref<256x128xbf16, #tpu.memory_space<vmem>>, vector<256x128xbf16>
    %cst_87 = arith.constant dense<0.000000e+00> : vector<8x128xf32>
    %245 = tpu.matmul %243, %244, %cst_87 {dimension_numbers = #tpu.dot_dimension_numbers<[1], [0], [0], [1], [0, 0, 1, 1], [], []>} : vector<8x256xbf16>, vector<256x128xbf16>, vector<8x128xf32> -> vector<8x128xf32>
    %c0_88 = arith.constant 0 : index
    %c0_89 = arith.constant 0 : index
    %246 = vector.load %arg20[%c0_88, %c0_89] : memref<1x128xf32, #tpu.memory_space<vmem>>, vector<1x128xf32>
    %247 = vector.broadcast %246 : vector<1x128xf32> to vector<8x128xf32>
    %248 = arith.addf %245, %247 : vector<8x128xf32>
    %249 = arith.addf %234, %248 : vector<8x128xf32>
    %cst_90 = arith.constant dense<0.000000e+00> : vector<8xf32>
    %250 = vector.multi_reduction <add>, %249, %cst_90 [1] : vector<8x128xf32> to vector<8xf32>
    %251 = vector.shape_cast %250 : vector<8xf32> to vector<8x1xf32>
    %cst_91 = arith.constant 1.280000e+02 : f32
    %252 = vector.broadcast %cst_91 : f32 to vector<8x1xf32>
    %253 = arith.divf %251, %252 : vector<8x1xf32>
    %254 = vector.broadcast %253 : vector<8x1xf32> to vector<8x128xf32>
    %255 = arith.subf %249, %254 : vector<8x128xf32>
    %256 = arith.mulf %255, %255 : vector<8x128xf32>
    %cst_92 = arith.constant dense<0.000000e+00> : vector<8xf32>
    %257 = vector.multi_reduction <add>, %256, %cst_92 [1] : vector<8x128xf32> to vector<8xf32>
    %258 = vector.shape_cast %257 : vector<8xf32> to vector<8x1xf32>
    %cst_93 = arith.constant 1.280000e+02 : f32
    %259 = vector.broadcast %cst_93 : f32 to vector<8x1xf32>
    %260 = arith.divf %258, %259 : vector<8x1xf32>
    %261 = vector.broadcast %253 : vector<8x1xf32> to vector<8x128xf32>
    %262 = arith.subf %249, %261 : vector<8x128xf32>
    %cst_94 = arith.constant 9.99999974E-6 : f32
    %263 = vector.broadcast %cst_94 : f32 to vector<8x1xf32>
    %264 = arith.addf %260, %263 : vector<8x1xf32>
    %265 = math.rsqrt %264 : vector<8x1xf32>
    %266 = vector.broadcast %265 : vector<8x1xf32> to vector<8x128xf32>
    %267 = arith.mulf %262, %266 : vector<8x128xf32>
    %c0_95 = arith.constant 0 : index
    %c0_96 = arith.constant 0 : index
    %268 = vector.load %arg21[%c0_95, %c0_96] : memref<1x128xf32, #tpu.memory_space<vmem>>, vector<1x128xf32>
    %269 = vector.broadcast %268 : vector<1x128xf32> to vector<8x128xf32>
    %270 = arith.mulf %267, %269 : vector<8x128xf32>
    %c0_97 = arith.constant 0 : index
    %c0_98 = arith.constant 0 : index
    %271 = vector.load %arg22[%c0_97, %c0_98] : memref<1x128xf32, #tpu.memory_space<vmem>>, vector<1x128xf32>
    %272 = vector.broadcast %271 : vector<1x128xf32> to vector<8x128xf32>
    %273 = arith.addf %270, %272 : vector<8x128xf32>
    %c0_99 = arith.constant 0 : index
    %c0_100 = arith.constant 0 : index
    %c0_101 = arith.constant 0 : index
    %274 = vector.load %arg23[%c0_99, %c0_100, %c0_101] : memref<1x8x128xf32, #tpu.memory_space<vmem>>, vector<1x8x128xf32>
    %275 = vector.shape_cast %274 : vector<1x8x128xf32> to vector<8x128xf32>
    %276 = vector.shape_cast %273 : vector<8x128xf32> to vector<1x8x128xf32>
    tpu.vector_store %arg23[%c0_99, %c0_100, %c0_101], %276 {strides = array<i32>} : memref<1x8x128xf32, #tpu.memory_space<vmem>>, vector<1x8x128xf32>,
    return
  }
  func.func @transform_0(%arg0: i32) -> (i32, i32, i32) {
    %c0_i32 = arith.constant 0 : i32
    %c0_i32_0 = arith.constant 0 : i32
    %c0_i32_1 = arith.constant 0 : i32
    return %arg0, %c0_i32, %c0_i32_0 : i32, i32, i32
  }
  func.func @transform_1(%arg0: i32) -> (i32, i32, i32) {
    %c0_i32 = arith.constant 0 : i32
    %c0_i32_0 = arith.constant 0 : i32
    %c0_i32_1 = arith.constant 0 : i32
    return %arg0, %c0_i32, %c0_i32_0 : i32, i32, i32
  }
  func.func @transform_2(%arg0: i32) -> (i32, i32) {
    %c0_i32 = arith.constant 0 : i32
    %c0_i32_0 = arith.constant 0 : i32
    %c0_i32_1 = arith.constant 0 : i32
    return %c0_i32, %c0_i32_0 : i32, i32
  }
  func.func @transform_3(%arg0: i32) -> (i32, i32) {
    %c0_i32 = arith.constant 0 : i32
    %c0_i32_0 = arith.constant 0 : i32
    %c0_i32_1 = arith.constant 0 : i32
    return %c0_i32, %c0_i32_0 : i32, i32
  }
  func.func @transform_4(%arg0: i32) -> (i32, i32) {
    %c0_i32 = arith.constant 0 : i32
    %c0_i32_0 = arith.constant 0 : i32
    %c0_i32_1 = arith.constant 0 : i32
    return %c0_i32, %c0_i32_0 : i32, i32
  }
  func.func @transform_5(%arg0: i32) -> (i32, i32) {
    %c0_i32 = arith.constant 0 : i32
    %c0_i32_0 = arith.constant 0 : i32
    %c0_i32_1 = arith.constant 0 : i32
    return %c0_i32, %c0_i32_0 : i32, i32
  }
  func.func @transform_6(%arg0: i32) -> (i32, i32) {
    %c0_i32 = arith.constant 0 : i32
    %c0_i32_0 = arith.constant 0 : i32
    %c0_i32_1 = arith.constant 0 : i32
    return %c0_i32, %c0_i32_0 : i32, i32
  }
  func.func @transform_7(%arg0: i32) -> (i32, i32) {
    %c0_i32 = arith.constant 0 : i32
    %c0_i32_0 = arith.constant 0 : i32
    %c0_i32_1 = arith.constant 0 : i32
    return %c0_i32, %c0_i32_0 : i32, i32
  }
  func.func @transform_8(%arg0: i32) -> (i32, i32) {
    %c0_i32 = arith.constant 0 : i32
    %c0_i32_0 = arith.constant 0 : i32
    %c0_i32_1 = arith.constant 0 : i32
    return %c0_i32, %c0_i32_0 : i32, i32
  }
  func.func @transform_9(%arg0: i32) -> (i32, i32) {
    %c0_i32 = arith.constant 0 : i32
    %c0_i32_0 = arith.constant 0 : i32
    %c0_i32_1 = arith.constant 0 : i32
    return %c0_i32, %c0_i32_0 : i32, i32
  }
  func.func @transform_10(%arg0: i32) -> (i32, i32) {
    %c0_i32 = arith.constant 0 : i32
    %c0_i32_0 = arith.constant 0 : i32
    %c0_i32_1 = arith.constant 0 : i32
    return %c0_i32, %c0_i32_0 : i32, i32
  }
  func.func @transform_11(%arg0: i32) -> (i32, i32) {
    %c0_i32 = arith.constant 0 : i32
    %c0_i32_0 = arith.constant 0 : i32
    %c0_i32_1 = arith.constant 0 : i32
    return %c0_i32, %c0_i32_0 : i32, i32
  }
  func.func @transform_12(%arg0: i32) -> (i32, i32) {
    %c0_i32 = arith.constant 0 : i32
    %c0_i32_0 = arith.constant 0 : i32
    %c0_i32_1 = arith.constant 0 : i32
    return %c0_i32, %c0_i32_0 : i32, i32
  }
  func.func @transform_13(%arg0: i32) -> (i32, i32) {
    %c0_i32 = arith.constant 0 : i32
    %c0_i32_0 = arith.constant 0 : i32
    %c0_i32_1 = arith.constant 0 : i32
    return %c0_i32, %c0_i32_0 : i32, i32
  }
  func.func @transform_14(%arg0: i32) -> (i32, i32) {
    %c0_i32 = arith.constant 0 : i32
    %c0_i32_0 = arith.constant 0 : i32
    %c0_i32_1 = arith.constant 0 : i32
    return %c0_i32, %c0_i32_0 : i32, i32
  }
  func.func @transform_15(%arg0: i32) -> (i32, i32) {
    %c0_i32 = arith.constant 0 : i32
    %c0_i32_0 = arith.constant 0 : i32
    %c0_i32_1 = arith.constant 0 : i32
    return %c0_i32, %c0_i32_0 : i32, i32
  }
  func.func @transform_16(%arg0: i32) -> (i32, i32) {
    %c0_i32 = arith.constant 0 : i32
    %c0_i32_0 = arith.constant 0 : i32
    %c0_i32_1 = arith.constant 0 : i32
    return %c0_i32, %c0_i32_0 : i32, i32
  }
  func.func @transform_17(%arg0: i32) -> (i32, i32) {
    %c0_i32 = arith.constant 0 : i32
    %c0_i32_0 = arith.constant 0 : i32
    %c0_i32_1 = arith.constant 0 : i32
    return %c0_i32, %c0_i32_0 : i32, i32
  }
  func.func @transform_18(%arg0: i32) -> (i32, i32) {
    %c0_i32 = arith.constant 0 : i32
    %c0_i32_0 = arith.constant 0 : i32
    %c0_i32_1 = arith.constant 0 : i32
    return %c0_i32, %c0_i32_0 : i32, i32
  }
  func.func @transform_19(%arg0: i32) -> (i32, i32) {
    %c0_i32 = arith.constant 0 : i32
    %c0_i32_0 = arith.constant 0 : i32
    %c0_i32_1 = arith.constant 0 : i32
    return %c0_i32, %c0_i32_0 : i32, i32
  }
  func.func @transform_20(%arg0: i32) -> (i32, i32) {
    %c0_i32 = arith.constant 0 : i32
    %c0_i32_0 = arith.constant 0 : i32
    %c0_i32_1 = arith.constant 0 : i32
    return %c0_i32, %c0_i32_0 : i32, i32
  }
  func.func @transform_21(%arg0: i32) -> (i32, i32) {
    %c0_i32 = arith.constant 0 : i32
    %c0_i32_0 = arith.constant 0 : i32
    %c0_i32_1 = arith.constant 0 : i32
    return %c0_i32, %c0_i32_0 : i32, i32
  }
  func.func @transform_22(%arg0: i32) -> (i32, i32, i32) {
    %c0_i32 = arith.constant 0 : i32
    %c0_i32_0 = arith.constant 0 : i32
    %c0_i32_1 = arith.constant 0 : i32
    return %arg0, %c0_i32, %c0_i32_0 : i32, i32, i32
  }
}

</mosaic_0001>

<bundles_post_ra>
// kernel: transformer_decoder_layer.1
= control target key start
LH: loop header
LB: loop body
LE: loop exit
PB: predicated region body
PF: predicated region fallthrough
CT: control target
= control target key end

     0   :  { %s4636_s0 = inlined_call_operand.hbm [shape: f32[2,8,128], index: 0, kind: input, shape index: {}]   ;;  %s4637_s1 = inlined_call_operand.hbm [shape: f32[2,8,128], index: 1, kind: input, shape index: {}]   ;;  %s4638_s2 = inlined_call_operand.hbm [shape: bf16[128,384], index: 2, kind: input, shape index: {}]   ;;  %s4639_s3 = inlined_call_operand.vmem [shape: f32[1,384], index: 3, kind: input, shape index: {}]   ;;  %s4640_s4 = inlined_call_operand.hbm [shape: bf16[128,128], index: 4, kind: input, shape index: {}]   ;;  %s4641_s5 = inlined_call_operand.vmem [shape: f32[1,128], index: 5, kind: input, shape index: {}]   ;;  %s4642_s6 = inlined_call_operand.vmem [shape: f32[1,128], index: 6, kind: input, shape index: {}]   ;;  %s4643_s7 = inlined_call_operand.hbm [shape: f32[1,128], index: 7, kind: input, shape index: {}]   ;;  %s4644_s8 = inlined_call_operand.hbm [shape: bf16[128,128], index: 8, kind: input, shape index: {}]   ;;  %s4645_s9 = inlined_call_operand.vmem [shape: f32[1,128], index: 9, kind: input, shape index: {}]   ;;  %s4646_s10 = inlined_call_operand.hbm [shape: bf16[128,256], index: 10, kind: input, shape index: {}]   ;;  %s4647_s11 = inlined_call_operand.vmem [shape: f32[1,256], index: 11, kind: input, shape index: {}]   ;;  %s4648_s12 = inlined_call_operand.hbm [shape: bf16[128,128], index: 12, kind: input, shape index: {}]   ;;  %s4649_s13 = inlined_call_operand.hbm [shape: f32[1,128], index: 13, kind: input, shape index: {}]   ;;  %s4650_s14 = inlined_call_operand.vmem [shape: f32[1,128], index: 14, kind: input, shape index: {}]   ;;  %s4651_s15 = inlined_call_operand.hbm [shape: f32[1,128], index: 15, kind: input, shape index: {}]   ;;  %s4652_s16 = inlined_call_operand.hbm [shape: bf16[128,256], index: 16, kind: input, shape index: {}]   ;;  %s4653_s17 = inlined_call_operand.hbm [shape: f32[1,256], index: 17, kind: input, shape index: {}]   ;;  %s4654_s18 = inlined_call_operand.hbm [shape: bf16[256,128], index: 18, kind: input, shape index: {}]   ;;  %s4655_s19 = inlined_call_operand.hbm [shape: f32[1,128], index: 19, kind: input, shape index: {}]   ;;  %s4656_s20 = inlined_call_operand.vmem [shape: f32[1,128], index: 20, kind: input, shape index: {}]   ;;  %s4657_s21 = inlined_call_operand.hbm [shape: f32[1,128], index: 21, kind: input, shape index: {}]   ;;  %s4658_s22 = inlined_call_operand.hbm [shape: f32[2,8,128], index: 22, kind: output, shape index: {}]  }
   0x1   :  { %4664 = sst [smem:[#allocation38_spill]] %s4636_s0 }
   0x2   :  { %4665 = sst [smem:[#allocation39_spill]] %s4637_s1 }
   0x3   :  { %4666 = sst [smem:[#allocation40_spill]] %s4638_s2 }
   0x4   :  { %4667 = sst [smem:[#allocation41_spill]] %s4639_s3 }
   0x5   :  { %4668 = sst [smem:[#allocation42_spill]] %s4640_s4 }
   0x6   :  { %4669 = sst [smem:[#allocation43_spill]] %s4641_s5 }
   0x7   :  { %4670 = sst [smem:[#allocation44_spill]] %s4642_s6 }
   0x8   :  { %4671 = sst [smem:[#allocation45_spill]] %s4643_s7 }
   0x9   :  { %4672 = sst [smem:[#allocation46_spill]] %s4644_s8 }
   0xa   :  { %4673 = sst [smem:[#allocation47_spill]] %s4645_s9 }
   0xb   :  { %4674 = sst [smem:[#allocation48_spill]] %s4646_s10 }
   0xc   :  { %4675 = sst [smem:[#allocation49_spill]] %s4647_s11 }
   0xd   :  { %4676 = sst [smem:[#allocation50_spill]] %s4648_s12 }
   0xe   :  { %4677 = sst [smem:[#allocation51_spill]] %s4649_s13 }
   0xf   :  { %4678 = sst [smem:[#allocation52_spill]] %s4650_s14 }
  0x10   :  { %4679 = sst [smem:[#allocation53_spill]] %s4651_s15 }
  0x11   :  { %4680 = sst [smem:[#allocation54_spill]] %s4652_s16 }
  0x12   :  { %4681 = sst [smem:[#allocation55_spill]] %s4653_s17 }
  0x13   :  { %4682 = sst [smem:[#allocation56_spill]] %s4654_s18 }
  0x14   :  { %4683 = sst [smem:[#allocation57_spill]] %s4655_s19 }
  0x15   :  { %4684 = sst [smem:[#allocation58_spill]] %s4656_s20 }
  0x16   :  { %4685 = sst [smem:[#allocation59_spill]] %s4658_s22 }
  0x17   :  { %27 = vsyncpa [#allocation3], 0 }
  0x18   :  { %29 = vsyncpa [#allocation3 + $0x1], 0 }
  0x19   :  { %30 = vsyncpa [#allocation6], 0 }
  0x1a   :  { %32 = vsyncpa [#allocation6 + $0x1], 0 }
  0x1b   :  { %33 = vsyncpa [#allocation9], 0 }
  0x1c   :  { %34 = vsyncpa [#allocation12], 0 }
  0x1d   :  { %35 = vsyncpa [#allocation15], 0 }
  0x1e   :  { %36 = vsyncpa [#allocation18], 0 }
  0x1f   :  { %37 = vsyncpa [#allocation21], 0 }
  0x20   :  { %38 = vsyncpa [#allocation24], 0 }
  0x21   :  { %39 = vsyncpa [#allocation4], 0 }
  0x22   :  { %41 = vsyncpa [#allocation4 + $0x1], 0  ;;  %s4206_s3 = smov 0   ;;  %s4208_s28 = smov 0  }
  0x23   :  { %s4210_s29 = smov 0   ;;  %s4212_s30 = smov 0  }
  0x24 LB: > { %s4686_s23 = sld [smem:[#allocation40_spill]]  ;;  %s4230_s5 = sadd.s32 4294967295, %s4066_s30   ;;  %s4066_s30 = sphi %s4212_s30, %s4722_s30   ;;  %s4062_s29 = sphi %s4210_s29, %s4721_s29   ;;  %s4058_s28 = sphi %s4208_s28, %s4720_s28   ;;  %s4054_s3 = sphi %s4206_s3, %s4719_s3  }
  0x25   : > { %p2740_p0 = scmp.ge.s32.totalorder %s4066_s30, 1  ;;  %p68_p1 = scmp.eq.s32.totalorder %s4230_s5, 0 }
  0x26   : > { %p550_p2 = scmp.lt.s32.totalorder %s4066_s30, 3  ;;  %s4068_s6 = smov [#allocation7]  }
  0x27   : > { %s563_s25 = sshll.u32 %s4068_s6, 4  ;;  %s4689_s27 = sld [smem:[#allocation42_spill]]  ;;  %s564_s25 = int_to_ptr.vmem [resolvable:$true] %s563_s25 }
  0x28   : > { %p4235_p3 = pnand %p2740_p0, %p550_p2  ;;  %s4070_s6 = smov 192  }
  0x29   : > { %s4071_s20 = smov 12   ;;  %s4663_s14 = smov 64  }
  0x2a   : > { %s561_s1 = sshll.u32 %s4686_s23, 4  ;;  %p3334_p4 = pneg %p4235_p3  ;;  %s562_s1 = int_to_ptr.hbm [resolvable:$true] %s561_s1 }
  0x2b   : > { %s4687_s24 = scalar_select %p4235_p3, 1, 0 }
  0x2c   : > { %p4247_p6 = pnand %p3334_p4, %p68_p1  ;;  %s4069_s23 = smov [#allocation8]  }
  0x2d   : > { %4688 = sst [smem:[#allocation37_spill]] %s4687_s24  ;;  %s578_s4 = sshll.u32 %s4689_s27, 4  ;;  %s579_s4 = int_to_ptr.hbm [resolvable:$true] %s578_s4 }
  0x2e   : > { %s580_s22 = sshll.u32 %s4069_s23, 4  ;;  %s4073_s26 = smov 4   ;;  %s581_s22 = int_to_ptr.vmem [resolvable:$true] %s580_s22 }
  0x2f   : > { %3337 = dma.hbm_to_vmem [thread:$0]  (!%p4247_p6), %s562_s1, 3072, %s564_s25, [#allocation6], %s4070_s6, %s4070_s6, %s4071_s20  }
  0x30   : > { %3340 = dma.hbm_to_vmem [thread:$0]  (!%p4247_p6), %s579_s4, 1024, %s581_s22, [#allocation9], %s4663_s14, %s4663_s14, %s4073_s26  }
  0x31   : > { %s4691_s8 = sld [smem:[#allocation46_spill]]  ;;  %s4074_s11 = smov [#allocation11]  }
  0x32   : > { %s612_s23 = sshll.u32 %s4074_s11, 4  ;;  %s4692_s12 = sld [smem:[#allocation50_spill]]  ;;  %s613_s23 = int_to_ptr.vmem [resolvable:$true] %s612_s23 }
  0x33   : > { %s4075_s22 = smov [#allocation14]   ;;  %s4693_s15 = sld [smem:[#allocation53_spill]] }
  0x34   : > { %s646_s25 = sshll.u32 %s4075_s22, 4  ;;  %s4694_s17 = sld [smem:[#allocation55_spill]]  ;;  %s647_s25 = int_to_ptr.vmem [resolvable:$true] %s646_s25 }
  0x35   : > { %s4077_s20 = smov [#allocation20]   ;;  %s4695_s19 = sld [smem:[#allocation57_spill]] }
  0x36   : > { %s702_s22 = sshll.u32 %s4077_s20, 4  ;;  %s4696_s7 = sld [smem:[#allocation45_spill]]  ;;  %s703_s22 = int_to_ptr.vmem [resolvable:$true] %s702_s22 }
  0x37   : > { %s610_s9 = sshll.u32 %s4691_s8, 4  ;;  %s4078_s24 = smov [#allocation23]   ;;  %s611_s9 = int_to_ptr.hbm [resolvable:$true] %s610_s9 }
  0x38   : > { %s644_s1 = sshll.u32 %s4692_s12, 4  ;;  %s4697_s10 = sld [smem:[#allocation48_spill]]  ;;  %s645_s1 = int_to_ptr.hbm [resolvable:$true] %s644_s1 }
  0x39   : > { %3346 = dma.hbm_to_vmem [thread:$0]  (!%p4247_p6), %s611_s9, 1024, %s613_s23, [#allocation12], %s4663_s14, %s4663_s14, %s4073_s26  }
  0x3a   : > { %s674_s2 = sshll.u32 %s4693_s15, 4  ;;  %s700_s27 = sshll.u32 %s4694_s17, 4  ;;  %s675_s2 = int_to_ptr.hbm [resolvable:$true] %s674_s2  ;;  %s701_s27 = int_to_ptr.hbm [resolvable:$true] %s700_s27 }
  0x3b   : > { %3352 = dma.hbm_to_vmem [thread:$0]  (!%p4247_p6), %s645_s1, 1024, %s647_s25, [#allocation15], %s4663_s14, %s4663_s14, %s4073_s26  }
  0x3c   : > { %s4076_s9 = smov [#allocation17]   ;;  %s726_s8 = sshll.u32 %s4695_s19, 4  ;;  %s727_s8 = int_to_ptr.hbm [resolvable:$true] %s726_s8 }
  0x3d   : > { %s676_s23 = sshll.u32 %s4076_s9, 4  ;;  %s599_s11 = sshll.u32 %s4696_s7, 4  ;;  %s677_s23 = int_to_ptr.vmem [resolvable:$true] %s676_s23  ;;  %s600_s11 = int_to_ptr.hbm [resolvable:$true] %s599_s11 }
  0x3e   : > { %3358 = dma.hbm_to_vmem [thread:$0]  (!%p4247_p6), %s675_s2, 16, %s677_s23, [#allocation18]  }
  0x3f   : > { %3364 = dma.hbm_to_vmem [thread:$0]  (!%p4247_p6), %s701_s27, 32, %s703_s22, [#allocation21]  }
  0x40   : > { %s728_s9 = sshll.u32 %s4078_s24, 4  ;;  %s4079_s2 = smov [#allocation10]   ;;  %s729_s9 = int_to_ptr.vmem [resolvable:$true] %s728_s9 }
  0x41   : > { %3370 = dma.hbm_to_vmem [thread:$0]  (!%p4247_p6), %s727_s8, 16, %s729_s9, [#allocation24]  }
  0x42   : > { %s601_s23 = sshll.u32 %s4079_s2, 4  ;;  %s627_s6 = sshll.u32 %s4697_s10, 4  ;;  %s602_s23 = int_to_ptr.vmem [resolvable:$true] %s601_s23  ;;  %s628_s6 = int_to_ptr.hbm [resolvable:$true] %s627_s6 }
  0x43   : > { %3343 = dma.hbm_to_vmem [thread:$0]  (!%p4247_p6), %s600_s11, 16, %s602_s23, [#allocation9]  }
  0x44   : > { %s4080_s27 = smov [#allocation13]   ;;  %s4698_s13 = sld [smem:[#allocation51_spill]] }
  0x45   : > { %s629_s22 = sshll.u32 %s4080_s27, 4  ;;  %s4081_s8 = smov 128   ;;  %s630_s22 = int_to_ptr.vmem [resolvable:$true] %s629_s22 }
  0x46   : > { %s4082_s9 = smov 8   ;;  %s4083_s2 = smov [#allocation16]  }
  0x47   : > { %3349 = dma.hbm_to_vmem [thread:$0]  (!%p4247_p6), %s628_s6, 2048, %s630_s22, [#allocation12], %s4081_s8, %s4081_s8, %s4082_s9  }
  0x48   : > { %s661_s20 = sshll.u32 %s4083_s2, 4  ;;  %s4699_s16 = sld [smem:[#allocation54_spill]]  ;;  %s662_s20 = int_to_ptr.vmem [resolvable:$true] %s661_s20 }
  0x49   : > { %s4700_s18 = sld [smem:[#allocation56_spill]]  ;;  %s4084_s25 = smov [#allocation19]  }
  0x4a   : > { %s659_s24 = sshll.u32 %s4698_s13, 4  ;;  %s687_s6 = sshll.u32 %s4084_s25, 4  ;;  %s660_s24 = int_to_ptr.hbm [resolvable:$true] %s659_s24  ;;  %s688_s6 = int_to_ptr.vmem [resolvable:$true] %s687_s6 }
  0x4b   : > { %3355 = dma.hbm_to_vmem [thread:$0]  (!%p4247_p6), %s660_s24, 16, %s662_s20, [#allocation15]  }
  0x4c   : > { %s4085_s14 = smov [#allocation22]   ;;  %s741_s20 = sshll.u32 %s4657_s21, 4  ;;  %s742_s20 = int_to_ptr.hbm [resolvable:$true] %s741_s20 }
  0x4d   : > { %s713_s22 = sshll.u32 %s4085_s14, 4  ;;  %s4701_s4 = smov 64   ;;  %s714_s22 = int_to_ptr.vmem [resolvable:$true] %s713_s22 }
  0x4e   : > { %s685_s11 = sshll.u32 %s4699_s16, 4  ;;  %s4324_s23 = sadd.s32 1, %s4066_s30   ;;  %s686_s11 = int_to_ptr.hbm [resolvable:$true] %s685_s11 }
  0x4f   : > { %s711_s1 = sshll.u32 %s4700_s18, 4  ;;  %s54_s27 = sadd.s32 1, %s4062_s29  ;;  %s712_s1 = int_to_ptr.hbm [resolvable:$true] %s711_s1 }
  0x50   : > { %3361 = dma.hbm_to_vmem [thread:$0]  (!%p4247_p6), %s686_s11, 2048, %s688_s6, [#allocation18], %s4081_s8, %s4081_s8, %s4082_s9  }
  0x51   : > { %3367 = dma.hbm_to_vmem [thread:$0]  (!%p4247_p6), %s712_s1, 2048, %s714_s22, [#allocation21], %s4701_s4, %s4701_s4, %s4073_s26  }
  0x52   : > { %s4086_s8 = smov [#allocation25]   ;;  %s2739_s11 = sadd.s32 4294967294, %s4066_s30  }
  0x53   : > { %s743_s9 = sshll.u32 %s4086_s8, 4  ;;  %s51_s25 = ssub.s32 %s4066_s30, %s4324_s23  ;;  %s744_s9 = int_to_ptr.vmem [resolvable:$true] %s743_s9 }
  0x54   : > { %3373 = dma.hbm_to_vmem [thread:$0]  (!%p4247_p6), %s742_s20, 16, %s744_s9, [#allocation24]  }
  0x55   : > { %p61_p7 = scmp.ne.s32.totalorder %s4062_s29, %s4058_s28  ;;  %p52_p8 = scmp.eq.s32.totalorder %s51_s25, 0 }
  0x56   : > { %p62_p9 = scmp.eq.s32.totalorder %s4066_s30, 0  ;;  %p67_p10 = scmp.ne.s32.totalorder %s4058_s28, %s4054_s3 }
  0x57   : > { %p537_p11 = scmp.eq.s32.totalorder %s4230_s5, 1  ;;  %p543_p2 = scmp.eq.s32.totalorder %s2739_s11, 1 }
  0x58   : > { %s4336_s26 = scalar_select %p52_p8, %s4062_s29, %s54_s27  }
  0x59   : > { %p4338_p12 = por %p62_p9, %p61_p7  ;;  %p4344_p13 = por %p68_p1, %p67_p10 }
  0x5a   : > { %p4348_p0 = por %p537_p11, %p61_p7  ;;  %p3398_p4 = scmp.lt.s32.totalorder %s4066_s30, 2 }
  0x5b   : > { %s754_s14 = sand.u32 1, %s4062_s29   ;;  %p4354_p6 = por %p543_p2, %p67_p10 }
  0x5c   : > { %s2755_s24 = sshll.u32 %s754_s14, 3  ;;  %s2756_s2 = sshll.u32 %s4066_s30, 3 }
  0x5d   : > { %s4706_s8 = sld [smem:[#allocation38_spill]]  ;;  %s758_s25 = scalar_lea.vmem [#allocation2], %s2755_s24 }
  0x5e   : > { %s766_s7 = sshll.u32 %s758_s25, 4  ;;  %p4364_p7 = pnand %p3398_p4, %p4338_p12  ;;  %s767_s7 = int_to_ptr.vmem [resolvable:$true] %s766_s7 }
  0x5f   : > { %s4708_s13 = sld [smem:[#allocation39_spill]]  ;;  %s773_s16 = sand.u32 1, %s4066_s30  }
  0x60   : > { %s755_s17 = scalar_lea.sflag [#allocation3], %s754_s14  ;;  %p3912_p9 = pneg %p4364_p7 }
  0x63   : > { %s762_s9 = scalar_lea.hbm %s4706_s8, %s2756_s2  ;;  %s3915_s25 = scalar_lea.hbm %s4706_s8, 16 }
  0x64   : > { %s764_s27 = sshll.u32 %s762_s9, 4  ;;  %s765_s27 = int_to_ptr.hbm [resolvable:$true] %s764_s27 }
  0x65   : > { %s781_s15 = scalar_lea.hbm %s4708_s13, %s2756_s2  ;;  %s3908_s20 = sshra.s32 %s765_s27, 4  ;;  %s3909_s20 = int_to_ptr.hbm [resolvable:$true] %s3908_s20 }
  0x66   : > { %s3910_s4 = scalar_lea.hbm %s3909_s20, 8  ;;  %p3916_p12 = scmp.lt.s32.totalorder %s3909_s20, %s4706_s8 }
  0x67   : > { %p3911_p8 = scmp.ne.s32.totalorder %s3909_s20, %s3910_s4  ;;  %p3917_p2 = scmp.lt.s32.totalorder %s3915_s25, %s3910_s4 }
  0x69   : > { %p3913_p10 = pnand %p3912_p9, %p3911_p8  ;;  %p3918_p4 = por %p3917_p2, %p3916_p12 }
  0x6b   : > { %p3914_p11 = pneg %p3913_p10 }
  0x6d   : > { %p3919_p5 = pnand %p3918_p4, %p3914_p11 }
  0x6f   : > { %3922 = shalt.err (!%p3919_p5)
}
  0x70   : > { %3377 = dma.hbm_to_vmem [thread:$0]  (!%p4364_p7), %s765_s27, 128, %s767_s7, %s755_s17  }
  0x71   : > { %s783_s14 = sshll.u32 %s781_s15, 4  ;;  %s777_s2 = scalar_lea.vmem [#allocation5], %s2755_s24  ;;  %s784_s14 = int_to_ptr.hbm [resolvable:$true] %s783_s14 }
  0x72   : > { %s785_s18 = sshll.u32 %s777_s2, 4  ;;  %s774_s19 = scalar_lea.sflag [#allocation6], %s773_s16  ;;  %s786_s18 = int_to_ptr.vmem [resolvable:$true] %s785_s18 }
  0x73   : > { %s3938_s1 = sshra.s32 %s784_s14, 4  ;;  %s3945_s25 = scalar_lea.hbm %s4708_s13, 16  ;;  %s3939_s1 = int_to_ptr.hbm [resolvable:$true] %s3938_s1 }
  0x74   : > { %s3940_s9 = scalar_lea.hbm %s3939_s1, 8  ;;  %p3946_p5 = scmp.lt.s32.totalorder %s3939_s1, %s4708_s13 }
  0x75   : > { %p3941_p8 = scmp.ne.s32.totalorder %s3939_s1, %s3940_s9  ;;  %p3947_p11 = scmp.lt.s32.totalorder %s3945_s25, %s3940_s9 }
  0x77   : > { %p3943_p10 = pnand %p3941_p8, %p3912_p9  ;;  %p3948_p2 = por %p3947_p11, %p3946_p5 }
  0x79   : > { %p3944_p12 = pneg %p3943_p10 }
  0x7b   : > { %p3949_p4 = pnand %p3948_p2, %p3944_p12 }
  0x7d   : > { %3952 = shalt.err (!%p3949_p4)
}
  0x7e   : > { %3380 = dma.hbm_to_vmem [thread:$0]  (!%p4364_p7), %s784_s14, 128, %s786_s18, %s774_s19  }
  0x7f   : > { %794 = sbr.rel (%p4235_p3) target bundleno = 3673 (0xe59), region = 108  ;;  %s4399_s16 = sand.u32 (!%p4235_p3), 1, %s4058_s28  }
  0x80   : > { %s4402_s17 = sshll.u32 (!%p4235_p3), %s4399_s16, 3  ;;  %s797_s24 = scalar_lea.sflag (!%p4235_p3), [#allocation3], %s4399_s16 }
  0x81   : > { %s800_s27 = scalar_lea.vmem (!%p4235_p3), [#allocation2], %s4402_s17 }
  0x84   : > { %4013 = dma.done.wait (%p4344_p13), %s797_s24, 128  }
  0x85   : > { %4015 = vsyncadd (%p4344_p13), %s797_s24, 4294967168  ;;  %s806_s18 = sand.u32 1, %s4230_s5   ;;  %s810_s11 = scalar_lea.vmem [#allocation5], %s4402_s17 }
  0x86   : > { %s807_s19 = scalar_lea.sflag [#allocation6], %s806_s18 }
  0x87   : > { %4017 = dma.done.wait (%p4344_p13), %s807_s19, 128  }
  0x88   : > { %4019 = vsyncadd (%p4344_p13), %s807_s19, 4294967168 }
  0x89   : > { %4021 = dma.done.wait (%p68_p1), [#allocation6], 3072  }
  0x8a   : > { %4023 = vsyncadd (%p68_p1), [#allocation6], 4294964224 }
  0x8b   : > { %4025 = dma.done.wait (%p68_p1), [#allocation9], 1040  }
  0x8c   : > { %4027 = vsyncadd (%p68_p1), [#allocation9], 4294966256 }
  0x8d   : > { %4029 = dma.done.wait (%p68_p1), [#allocation12], 3072  }
  0x8e   : > { %4031 = vsyncadd (%p68_p1), [#allocation12], 4294964224 }
  0x8f   : > { %4033 = dma.done.wait (%p68_p1), [#allocation15], 1040  }
  0x90   : > { %4035 = vsyncadd (%p68_p1), [#allocation15], 4294966256 }
  0x91   : > { %4037 = dma.done.wait (%p68_p1), [#allocation18], 2064  }
  0x92   : > { %4039 = vsyncadd (%p68_p1), [#allocation18], 4294965232 }
  0x93   : > { %4041 = dma.done.wait (%p68_p1), [#allocation21], 2080  }
  0x94   : > { %4043 = vsyncadd (%p68_p1), [#allocation21], 4294965216 }
  0x95   : > { %4045 = dma.done.wait (%p68_p1), [#allocation24], 32  }
  0x96   : > { %4047 = vsyncadd (%p68_p1), [#allocation24], 4294967264  ;;  %v2862_v0 = vld [vmem:[#allocation7 + $0xa8] sm:$0xf]  ;;  %v3202_v1 = vld [vmem:[#allocation7 + $0xb0] sm:$0xf0] }
  0x97   : > { %v3201_v2 = vld [vmem:[#allocation7 + $0xac] sm:$0xf]  ;;  %v2863_v3 = vor.u32 %v3202_v1, %v2862_v0  ;;  %v2864_v4 = vld [vmem:[#allocation7 + $0xb4] sm:$0xf0]  ;;  %v2850_v5 = vld [vmem:[#allocation7 + $0x90] sm:$0xf] }
  0x98   : > { %v3199_v6 = vld [vmem:[#allocation7 + $0x98] sm:$0xf0]  ;;  %v2867_v7 = vor.u32 %v3201_v2, %v2864_v4  ;;  %v3198_v8 = vld [vmem:[#allocation7 + $0x94] sm:$0xf]  ;;  %v2852_v9 = vld [vmem:[#allocation7 + $0x9c] sm:$0xf0] }
  0x99   : > { %1114 = vmatpush.bf16.msra.mxu0 %v2863_v3  ;;  %v2851_v10 = vor.u32 %v3199_v6, %v2850_v5  ;;  %v2855_v11 = vor.u32 %v3198_v8, %v2852_v9  ;;  %v2838_v12 = vld [vmem:[#allocation7 + $0x78] sm:$0xf]  ;;  %v3196_v13 = vld [vmem:[#allocation7 + $0x80] sm:$0xf0]  ;;  %v3195_v14 = vld [vmem:[#allocation7 + $0x7c] sm:$0xf] }
  0x9a   : > { %1127 = vmatpush.bf16.msra.mxu1 %v2867_v7  ;;  %v2840_v15 = vld [vmem:[#allocation7 + $0x84] sm:$0xf0]  ;;  %v2839_v16 = vor.u32 %v3196_v13, %v2838_v12  ;;  %v2826_v18 = vld [vmem:[#allocation7 + $0x60] sm:$0xf]  ;;  %v3193_v19 = vld [vmem:[#allocation7 + $0x68] sm:$0xf0] }
  0x9b   : > { %v2843_v17 = vor.u32 %v3195_v14, %v2840_v15  ;;  %v3192_v20 = vld [vmem:[#allocation7 + $0x64] sm:$0xf]  ;;  %v2828_v21 = vld [vmem:[#allocation7 + $0x6c] sm:$0xf0]  ;;  %v2827_v22 = vor.u32 %v3193_v19, %v2826_v18  ;;  %v3203_v24 = vld [vmem:[#allocation7 + $0xb8] sm:$0xf0] }
  0x9c   : > { %v2870_v23 = vld [vmem:[#allocation7 + $0xb0] sm:$0xf]  ;;  %v2858_v25 = vld [vmem:[#allocation7 + $0x98] sm:$0xf]  ;;  %v2831_v26 = vor.u32 %v3192_v20, %v2828_v21  ;;  %v2814_v27 = vld [vmem:[#allocation7 + $0x48] sm:$0xf] }
  0x9d   : > { %1115 = vmatpush.bf16.msra.mxu0 %v2851_v10  ;;  %v3190_v28 = vld [vmem:[#allocation7 + $0x50] sm:$0xf0]  ;;  %v2871_v29 = vor.u32 %v3203_v24, %v2870_v23  ;;  %v3200_v30 = vld [vmem:[#allocation7 + $0xa0] sm:$0xf0]  ;;  %v3189_v31 = vld [vmem:[#allocation7 + $0x4c] sm:$0xf] }
  0x9e   : > { %1128 = vmatpush.bf16.msra.mxu1 %v2855_v11  ;;  %v2816_v32 = vld [vmem:[#allocation7 + $0x54] sm:$0xf0]  ;;  %v2802_v33 = vld [vmem:[#allocation7 + $0x30] sm:$0xf]  ;;  %v2859_v34 = vor.u32 %v3200_v30, %v2858_v25  ;;  %v2815_v35 = vor.u32 %v3190_v28, %v2814_v27  ;;  %v3187_v36 = vld [vmem:[#allocation7 + $0x38] sm:$0xf0] }
  0x9f   : > { %1140 = vmatpush.bf16.msra.mxu2 %v2871_v29  ;;  %v2846_v37 = vld [vmem:[#allocation7 + $0x80] sm:$0xf]  ;;  %v3197_v38 = vld [vmem:[#allocation7 + $0x88] sm:$0xf0]  ;;  %v2819_v39 = vor.u32 %v3189_v31, %v2816_v32  ;;  %v3186_v40 = vld [vmem:[#allocation7 + $0x34] sm:$0xf]  ;;  %v2803_v45 = vor.u32 %v3187_v36, %v2802_v33 }
  0xa0   : > { %v2804_v41 = vld [vmem:[#allocation7 + $0x3c] sm:$0xf0]  ;;  %v2834_v42 = vld [vmem:[#allocation7 + $0x68] sm:$0xf]  ;;  %v3194_v43 = vld [vmem:[#allocation7 + $0x70] sm:$0xf0]  ;;  %v2847_v44 = vor.u32 %v3197_v38, %v2846_v37 }
  0xa1   : > { %1116 = vmatpush.bf16.msra.mxu0 %v2839_v16  ;;  %v2807_v46 = vor.u32 %v3186_v40, %v2804_v41  ;;  %v2790_v47 = vld [vmem:[#allocation7 + $0x18] sm:$0xf]  ;;  %v3184_v48 = vld [vmem:[#allocation7 + $0x20] sm:$0xf0]  ;;  %v3183_v49 = vld [vmem:[#allocation7 + $0x1c] sm:$0xf]  ;;  %v2835_v51 = vor.u32 %v3194_v43, %v2834_v42 }
  0xa2   : > { %1129 = vmatpush.bf16.msra.mxu1 %v2843_v17  ;;  %v2792_v50 = vld [vmem:[#allocation7 + $0x24] sm:$0xf0]  ;;  %v2791_v52 = vor.u32 %v3184_v48, %v2790_v47  ;;  %v2822_v53 = vld [vmem:[#allocation7 + $0x50] sm:$0xf]  ;;  %v3191_v54 = vld [vmem:[#allocation7 + $0x58] sm:$0xf0] }
  0xa3   : > { %1141 = vmatpush.bf16.msra.mxu2 %v2859_v34  ;;  %v2795_v55 = vor.u32 %v3183_v49, %v2792_v50  ;;  %v2778_v56 = vld [vmem:[#allocation7] sm:$0xf]  ;;  %v3181_v57 = vld [vmem:[#allocation7 + $0x8] sm:$0xf0]  ;;  %v3180_v58 = vld [vmem:[#allocation7 + $0x4] sm:$0xf]  ;;  %v2823_v60 = vor.u32 %v3191_v54, %v2822_v53 }
  0xa4   : > { %v2780_v59 = vld [vmem:[#allocation7 + $0xc] sm:$0xf0]  ;;  %v2779_v61 = vor.u32 %v3181_v57, %v2778_v56  ;;  %v4446_v62 = vld [vmem:[%s800_s27] sm:$0xff]  ;;  %v2810_v63 = vld [vmem:[#allocation7 + $0x38] sm:$0xf]  ;;  %s4710_s14 = sld [smem:[#allocation41_spill]] }
  0xa5   : > { %1117 = vmatpush.bf16.msra.mxu0 %v2827_v22  ;;  %v3188_v0 = vld [vmem:[#allocation7 + $0x40] sm:$0xf0]  ;;  %v2783_v1 = vor.u32 %v3180_v58, %v2780_v59  ;;  %v945_v2 = vpack.c.bf16 %v4446_v62, %v4446_v62  ;;  %v2798_v4 = vld [vmem:[#allocation7 + $0x20] sm:$0xf]  ;;  %v3185_v5 = vld [vmem:[#allocation7 + $0x28] sm:$0xf0] }
  0xa6   : > { %1130 = vmatpush.bf16.msra.mxu1 %v2831_v26  ;;  %v2811_v3 = vor.u32 %v3188_v0, %v2810_v63  ;;  %v2799_v6 = vor.u32 %v3185_v5, %v2798_v4  ;;  %v2786_v7 = vld [vmem:[#allocation7 + $0x8] sm:$0xf]  ;;  %v3182_v8 = vld [vmem:[#allocation7 + $0x10] sm:$0xf0]  ;;  %vm1175_vm0 = vcmask 261120   ;;  %s4087_s2 = smov 64  }
  0xa7   : > { %1142 = vmatpush.bf16.msra.mxu2 %v2847_v44  ;;  %v2787_v9 = vor.u32 %v3182_v8, %v2786_v7  ;;  %s4088_s1 = smov 96   ;;  %s4089_s9 = smov 32   ;;  %vm1224_vm1 = vcmask 1043456   ;;  %vm1195_vm2 = vcmask 64512  }
  0xa8   : > { %s4711_s25 = sld [smem:[#allocation43_spill]]  ;;  %s941_s24 = scalar_lea.vmem [#allocation26], %s4402_s17 }
  0xa9   : > { %1118 = vmatpush.bf16.msra.mxu0 %v2815_v35  ;;  %s4712_s15 = sld [smem:[#allocation44_spill]]  ;;  %s2520_s27 = sshll.u32 %s941_s24, 4  ;;  %s2521_s27 = int_to_ptr.vmem [resolvable:$true] %s2520_s27 }
  0xaa   : > { %1131 = vmatpush.bf16.msra.mxu1 %v2819_v39  ;;  %v978_v10 = vld [vmem:[%s4710_s14] sm:$0x7]  ;;  %s4713_s18 = sld [smem:[#allocation49_spill]] }
  0xab   : > { %1143 = vmatpush.bf16.msra.mxu2 %v2835_v51  ;;  %v981_v11 = vperm.slane %v978_v10, 1  ;;  %v980_v14 = vperm.slane %v978_v10, 0  ;;  %v982_v23 = vperm.slane %v978_v10, 2  ;;  %s4714_s0 = sld [smem:[#allocation47_spill]] }
  0xac   : > { %s4716_s4 = sld [smem:[#allocation58_spill]] }
  0xad   : > { %1119 = vmatpush.bf16.msra.mxu0 %v2803_v45  ;;  %s4717_s7 = sld [smem:[#allocation59_spill]] }
  0xae   : > { %1132 = vmatpush.bf16.msra.mxu1 %v2807_v46 }
  0xaf   : > { %1144 = vmatpush.bf16.msra.mxu2 %v2823_v60 }
  0xb1   : > { %1120 = vmatpush.bf16.msra.mxu0 %v2791_v52 }
  0xb2   : > { %1133 = vmatpush.bf16.msra.mxu1 %v2795_v55 }
  0xb3   : > { %1145 = vmatpush.bf16.msra.mxu2 %v2811_v3  ;;  %s3988_s14 = scalar_lea.hbm %s4717_s7, 16 }
  0xb5   : > { %1121 = vmatpush.bf16.msra.mxu0 %v2779_v61 }
  0xb6   : > { %1134 = vmatpush.bf16.msra.mxu1 %v2783_v1 }
  0xb7   : > { %1146 = vmatpush.bf16.msra.mxu2 %v2799_v6 }
  0xb8   : > { %1122 = vmatmul.bf16.vlgmr.msra.gmra.mxu0 %v945_v2 }
  0xb9   : > { %1135 = vmatmul.bf16.vlgmr.msra.gmra.mxu1 %v945_v2 }
  0xbb   : > { %1147 = vmatpush.bf16.msra.mxu2 %v2787_v9 }
  0xbe   : > { %1148 = vmatmul.bf16.vlgmr.msra.gmra.mxu2 %v945_v2 }
 0x135   : > { %v1123_v12 = vpop.f32.mrf.mxu0 }
 0x136   : > { %v1136_v13 = vpop.f32.mrf.mxu1  ;;  %v1124_v17 = vadd.f32 %v1123_v12, %v980_v14 }
 0x137   : > { %v1137_v15 = vadd.f32 %v1136_v13, %v981_v11 }
 0x138   : > { %v1172_v21 = vpack.c.bf16 %v1124_v17, %v1124_v17 }
 0x139   : > { %v1173_v16 = vpack.c.bf16 %v1137_v15, %v1137_v15 }
 0x13b   : > { %1315 = vrot.lane.b32.xlu2 %v1173_v16, %s4087_s2  ;;  %1245 = vrot.lane.b32.xlu1 %v1173_v16, %s4088_s1  ;;  %v1180_v18 = vsel %vm1175_vm0, %v1173_v16, 0 }
 0x13c   : > { %1189 = vmatpush.bf16.xpose.msra.mxu3 %v1180_v18 }
 0x13d   : > { %v1125_v19 = vpop.f32.mrf.mxu0 }
 0x13e   : > { %v1138_v20 = vpop.f32.mrf.mxu1 }
 0x141   : > { %v1149_v22 = vpop.f32.mrf.mxu2 }
 0x142   : > { %v1150_v24 = vadd.f32 %v1149_v22, %v982_v23 }
 0x143   : > { %1384 = vrot.lane.b32.xlu2 %v1173_v16, %s4089_s9  ;;  %1242 = vrot.lane.b32.xlu1 %v1172_v21, %s4088_s1 }
 0x144   : > { %2872 = vmatmul.msk.bf16.vlgmr.msra.gmra.mxu3 %vm1175_vm0, %v1172_v21  ;;  %v4460_v26 = vpack.c.bf16 %v1150_v24, %v1150_v24 }
 0x146   : > { %v1226_v27 = vsel %vm1224_vm1, %v4460_v26, 0 }
 0x147   : > { %1235 = vmatpush.bf16.msrb.mxu3 %v1226_v27 }
 0x149   : > { %v1151_v25 = vpop.f32.mrf.mxu2 }
 0x14b   : > { %1382 = vrot.lane.b32.xlu1 %v1172_v21, %s4089_s9 }
 0x195   : > { %v1316_v28 = vpop.permute.xlu2 %1315 }
 0x196   : > { %v1321_v29 = vsel %vm1175_vm0, %v1316_v28, 0 }
 0x197   : > { %1330 = vmatpush.bf16.xpose.msrb.mxu2 %v1321_v29 }
 0x19d   : > { %v1385_v52 = vpop.permute.xlu2 %1384 }
 0x19e   : > { %v1390_v55 = vsel %vm1175_vm0, %v1385_v52, 0 }
 0x1ad   : > { %v1246_v30 = vpop.permute.xlu1 %1245 }
 0x1ae   : > { %v1251_v31 = vsel %vm1175_vm0, %v1246_v30, 0 }
 0x1af   : > { %1260 = vmatpush.bf16.xpose.msra.mxu3 %v1251_v31 }
 0x1b5   : > { %v1243_v56 = vpop.permute.xlu1 %1242 }
 0x1bd   : > { %v1383_v57 = vpop.permute.xlu1 %1382 }
 0x1c7   : > { %v1191_v32 = vpop.f32.mrf.mxu3 }
 0x1c8   : > { %v1196_v33 = vsel %vm1195_vm2, %v1191_v32, -inf }
 0x1c9   : > { %1197 = vmax.xlane.f32.xlu0 %v1196_v33 }
 0x1cf   : > { %v1193_v34 = vpop.f32.mrf.mxu3 }
 0x23c   : > { %v1198_v35 = vpop.xlane.xlu0 %1197 }
 0x23d   : > { %v1199_v36 = vsub.f32 %v1191_v32, %v1198_v35 }
 0x23f   : > { %v1200_v37 = vmul.f32 1.442695, %v1199_v36 }
 0x241   : > { %3478 = vpow2.f32 %v1200_v37 }
 0x247   : > { %v3479_v38 = vpop.eup %3478 }
 0x248   : > { %v1202_v39 = vsel %vm1195_vm2, %v3479_v38, 0.0 }
 0x249   : > { %1203 = vadd.xlane.f32.xlu0 %v1202_v39 }
 0x25d   : > { %1313 = vrot.lane.b32.xlu0 %v1172_v21, %s4087_s2 }
 0x2bc   : > { %v1204_v40 = vpop.xlane.xlu0 %1203 }
 0x2bd   : > { %3480 = vrcp.f32 %v1204_v40  ;;  %v1216_v44 = vand.u32 2147483648, %v1204_v40  ;;  %v1214_v46 = vand.u32 2147483647, %v1204_v40  ;;  %vm1210_vm4 = vweird.f32 %v1204_v40 }
 0x2bf   : > { %v1217_v48 = vor.u32 1.1754944e-38, %v1216_v44  ;;  %vm1215_vm6 = vcmp.eq.f32.partialorder %v1214_v46, 8.507059e+37 }
 0x2c3   : > { %v3481_v41 = vpop.eup %3480 }
 0x2c4   : > { %v1206_v42 = vmul.f32 %v3481_v41, %v1204_v40  ;;  %vm1211_vm3 = vweird.f32 %v3481_v41 }
 0x2c5   : > { %vm1212_vm5 = vmor %vm1210_vm4, %vm1211_vm3 }
 0x2c6   : > { %v1207_v43 = vsub.f32 1.0, %v1206_v42 }
 0x2c8   : > { %v1208_v45 = vmul.f32 %v3481_v41, %v1207_v43 }
 0x2ca   : > { %v1209_v47 = vadd.f32 %v3481_v41, %v1208_v45 }
 0x2cc   : > { %v1213_v49 = vsel %vm1212_vm5, %v3481_v41, %v1209_v47 }
 0x2cd   : > { %v1218_v50 = vsel %vm1215_vm6, %v1217_v48, %v1213_v49  ;;  %vm1464_vm6 = vcmask 523264  }
 0x2ce   : > { %v1219_v51 = vmul.f32 %v3479_v38, %v1218_v50 }
 0x2cf   : > { %v1314_v53 = vpop.permute.xlu0 %1313 }
 0x2d0   : > { %2876 = vmatmul.msk.bf16.vlgmr.msrb.gmra.mxu2 %vm1175_vm0, %v1314_v53  ;;  %v1220_v54 = vpack.c.bf16 %v1219_v51, %v1219_v51 }
 0x2d2   : > { %2873 = vmatmul.msk.bf16.vlgmr.msrb.gmra.mxu3 %vm1195_vm2, %v1220_v54 }
 0x2d3   : > { %1399 = vmatpush.bf16.xpose.msrb.mxu3 %v1390_v55 }
 0x2e2   : > { %2874 = vmatmul.msk.bf16.vlgmr.msra.gmra.mxu3 %vm1175_vm0, %v1243_v56 }
 0x2f2   : > { %2878 = vmatmul.msk.bf16.vlgmr.msrb.gmra.mxu3 %vm1175_vm0, %v1383_v57 }
 0x353   : > { %v1332_v58 = vpop.f32.mrf.mxu2 }
 0x354   : > { %v1336_v59 = vsel %vm1195_vm2, %v1332_v58, -inf }
 0x355   : > { %1337 = vmax.xlane.f32.xlu1 %v1336_v59  ;;  %v4475_v60 = vpop.f32.mrf.mxu3 }
 0x35b   : > { %v1334_v61 = vpop.f32.mrf.mxu2 }
 0x35d   : > { %v1239_v63 = vpop.f32.mrf.mxu3 }
 0x365   : > { %v1262_v0 = vpop.f32.mrf.mxu3 }
 0x366   : > { %v1266_v1 = vsel %vm1195_vm2, %v1262_v0, -inf }
 0x367   : > { %1267 = vmax.xlane.f32.xlu2 %v1266_v1 }
 0x36d   : > { %v1264_v2 = vpop.f32.mrf.mxu3 }
 0x375   : > { %v1401_v3 = vpop.f32.mrf.mxu3 }
 0x376   : > { %v1405_v4 = vsel %vm1195_vm2, %v1401_v3, -inf }
 0x377   : > { %1406 = vmax.xlane.f32.xlu0 %v1405_v4 }
 0x37d   : > { %v1403_v5 = vpop.f32.mrf.mxu3 }
 0x38b   : > { %1430 = vrot.lane.b32.xlu0 %v4460_v26, %s4089_s9 }
 0x3c8   : > { %v1338_v6 = vpop.xlane.xlu1 %1337 }
 0x3c9   : > { %v1339_v7 = vsub.f32 %v1332_v58, %v1338_v6 }
 0x3cb   : > { %v1340_v8 = vmul.f32 1.442695, %v1339_v7 }
 0x3cd   : > { %3482 = vpow2.f32 %v1340_v8 }
 0x3d3   : > { %v4481_v9 = vpop.eup %3482 }
 0x3d4   : > { %v1342_v10 = vsel %vm1195_vm2, %v4481_v9, 0.0 }
 0x3d5   : > { %1343 = vadd.xlane.f32.xlu2 %v1342_v10  ;;  %v3211_v10 = vld [vmem:[#allocation8 + $0x38] sm:$0xff] }
 0x3d6   : > { %1520 = vmatpush.bf16.msrb.mxu1 %v3211_v10  ;;  %v3212_v10 = vld [vmem:[#allocation11] sm:$0xff] }
 0x3da   : > { %v1268_v11 = vpop.xlane.xlu2 %1267 }
 0x3db   : > { %v1269_v12 = vsub.f32 %v1262_v0, %v1268_v11  ;;  %v3210_v11 = vld [vmem:[#allocation8 + $0x30] sm:$0xff] }
 0x3dc   : > { %1521 = vmatpush.bf16.msrb.mxu1 %v3210_v11 }
 0x3dd   : > { %v1270_v13 = vmul.f32 1.442695, %v1269_v12  ;;  %v3209_v12 = vld [vmem:[#allocation8 + $0x28] sm:$0xff] }
 0x3df   : > { %3484 = vpow2.f32 %v1270_v13  ;;  %v3208_v13 = vld [vmem:[#allocation8 + $0x20] sm:$0xff] }
 0x3e0   : > { %1522 = vmatpush.bf16.msrb.mxu1 %v3209_v12 }
 0x3e4   : > { %1523 = vmatpush.bf16.msrb.mxu1 %v3208_v13 }
 0x3e5   : > { %v3485_v14 = vpop.eup %3484 }
 0x3e6   : > { %v1272_v15 = vsel %vm1195_vm2, %v3485_v14, 0.0 }
 0x3e7   : > { %1273 = vadd.xlane.f32.xlu2 %v1272_v15  ;;  %v3206_v15 = vld [vmem:[#allocation8 + $0x10] sm:$0xff] }
 0x3ea   : > { %v1407_v16 = vpop.xlane.xlu0 %1406 }
 0x3eb   : > { %v1408_v17 = vsub.f32 %v1401_v3, %v1407_v16  ;;  %v3205_v16 = vld [vmem:[#allocation8 + $0x8] sm:$0xff] }
 0x3ed   : > { %v1409_v18 = vmul.f32 1.442695, %v1408_v17  ;;  %v3204_v17 = vld [vmem:[#allocation8] sm:$0xff] }
 0x3ef   : > { %3486 = vpow2.f32 %v1409_v18 }
 0x3f5   : > { %v3487_v19 = vpop.eup %3486 }
 0x3f6   : > { %v1411_v20 = vsel %vm1195_vm2, %v3487_v19, 0.0 }
 0x3f7   : > { %1412 = vadd.xlane.f32.xlu1 %v1411_v20 }
 0x3fd   : > { %v1431_v24 = vpop.permute.xlu0 %1430 }
 0x3fe   : > { %v1436_v29 = vsel %vm1224_vm1, %v1431_v24, 0 }
 0x3ff   : > { %1292 = vrot.lane.b32.xlu2 %v4460_v26, %s4088_s1 }
 0x410   : > { %1361 = vrot.lane.b32.xlu1 %v4460_v26, %s4087_s2 }
 0x448   : > { %v1344_v21 = vpop.xlane.xlu2 %1343 }
 0x449   : > { %v1356_v51 = vand.u32 2147483648, %v1344_v21  ;;  %vm1350_vm14 = vweird.f32 %v1344_v21  ;;  %v1354_v53 = vand.u32 2147483647, %v1344_v21 }
 0x44b   : > { %v1357_v58 = vor.u32 1.1754944e-38, %v1356_v51  ;;  %vm1355_vm5 = vcmp.eq.f32.partialorder %v1354_v53, 8.507059e+37  ;;  %v2954_v53 = vld [vmem:[#allocation13 + $0x10] sm:$0xf] }
 0x45a   : > { %v1274_v22 = vpop.xlane.xlu2 %1273 }
 0x45b   : > { %3488 = vrcp.f32 %v1274_v22  ;;  %v1286_v32 = vand.u32 2147483648, %v1274_v22  ;;  %v1284_v33 = vand.u32 2147483647, %v1274_v22  ;;  %vm1280_vm8 = vweird.f32 %v1274_v22 }
 0x45c   : > { %3490 = vrcp.f32 %v1344_v21 }
 0x45d   : > { %v1287_v35 = vor.u32 1.1754944e-38, %v1286_v32  ;;  %vm1285_vm10 = vcmp.eq.f32.partialorder %v1284_v33, 8.507059e+37  ;;  %v3235_v32 = vld [vmem:[#allocation13 + $0x74] sm:$0xf0]  ;;  %v2994_v33 = vld [vmem:[#allocation13 + $0x60] sm:$0xf] }
 0x461   : > { %v3489_v23 = vpop.eup %3488 }
 0x462   : > { %v1276_v25 = vmul.f32 %v3489_v23, %v1274_v22  ;;  %v1293_v27 = vpop.permute.xlu2 %1292  ;;  %vm1281_vm7 = vweird.f32 %v3489_v23  ;;  %v3491_v26 = vpop.eup %3490 }
 0x463   : > { %v1298_v28 = vsel %vm1224_vm1, %v1293_v27, 0  ;;  %vm1282_vm9 = vmor %vm1280_vm8, %vm1281_vm7  ;;  %v1346_v38 = vmul.f32 %v3491_v26, %v1344_v21  ;;  %vm1351_vm12 = vweird.f32 %v3491_v26  ;;  %vm1466_vm7 = vcmask 785408  }
 0x464   : > { %v1277_v30 = vsub.f32 1.0, %v1276_v25  ;;  %1307 = vmatpush.bf16.msrb.mxu0 %v1298_v28  ;;  %vm1352_vm3 = vmor %vm1350_vm14, %vm1351_vm12  ;;  %v3468_v25 = vld [vmem:[%s4711_s25] ss:$0 sm:$0xff] }
 0x465   : > { %v1347_v41 = vsub.f32 1.0, %v1346_v38  ;;  %v3231_v38 = vld [vmem:[#allocation13 + $0x54] sm:$0xf0] }
 0x466   : > { %v1278_v31 = vmul.f32 %v3489_v23, %v1277_v30 }
 0x467   : > { %v1348_v45 = vmul.f32 %v3491_v26, %v1347_v41 }
 0x468   : > { %1445 = vmatpush.bf16.msra.mxu0 %v1436_v29  ;;  %v1279_v34 = vadd.f32 %v3489_v23, %v1278_v31  ;;  %v4090_v31 = vmov 128.0  }
 0x469   : > { %v1349_v50 = vadd.f32 %v3491_v26, %v1348_v45  ;;  %v2970_v45 = vld [vmem:[#allocation13 + $0x30] sm:$0xf] }
 0x46a   : > { %v1413_v36 = vpop.xlane.xlu1 %1412  ;;  %v1283_v37 = vsel %vm1282_vm9, %v3489_v23, %v1279_v34  ;;  %v3233_v34 = vld [vmem:[#allocation13 + $0x64] sm:$0xf0] }
 0x46b   : > { %3492 = vrcp.f32 %v1413_v36  ;;  %v1288_v39 = vsel %vm1285_vm10, %v1287_v35, %v1283_v37  ;;  %v1425_v47 = vand.u32 2147483648, %v1413_v36  ;;  %v1423_v49 = vand.u32 2147483647, %v1413_v36  ;;  %v2986_v37 = vld [vmem:[#allocation13 + $0x50] sm:$0xf] }
 0x46c   : > { %v1289_v40 = vmul.f32 %v3485_v14, %v1288_v39  ;;  %vm1419_vm13 = vweird.f32 %v1413_v36  ;;  %v1353_v56 = vsel %vm1352_vm3, %v3491_v26, %v1349_v50  ;;  %v3207_v14 = vld [vmem:[#allocation8 + $0x18] sm:$0xff]  ;;  %3494 = vrcp.f32 %v4090_v31  ;;  %v3225_v50 = vld [vmem:[#allocation13 + $0x24] sm:$0xf0] }
 0x46d   : > { %v1426_v54 = vor.u32 1.1754944e-38, %v1425_v47  ;;  %vm1424_vm4 = vcmp.eq.f32.partialorder %v1423_v49, 8.507059e+37  ;;  %v1358_v61 = vsel %vm1355_vm5, %v1357_v58, %v1353_v56  ;;  %1524 = vmatpush.bf16.msrb.mxu1 %v3207_v14  ;;  %v2995_v35 = vor.u32 %v3233_v34, %v2994_v33  ;;  %v3219_v39 = vld [vmem:[#allocation11 + $0x38] sm:$0xff]  ;;  %v2962_v49 = vld [vmem:[#allocation13 + $0x20] sm:$0xf] }
 0x46e   : > { %v1290_v42 = vpack.c.bf16 %v1289_v40, %v1289_v40  ;;  %v1359_v0 = vmul.f32 %v4481_v9, %v1358_v61  ;;  %v2987_v41 = vor.u32 %v3231_v38, %v2986_v37 }
 0x470   : > { %2875 = vmatmul.msk.bf16.vlgmr.msrb.gmra.mxu0 %vm1195_vm2, %v1290_v42  ;;  %v1360_v3 = vpack.c.bf16 %v1359_v0, %v1359_v0  ;;  %v3229_v42 = vld [vmem:[#allocation13 + $0x44] sm:$0xf0] }
 0x471   : > { %v3493_v43 = vpop.eup %3492  ;;  %1525 = vmatpush.bf16.msrb.mxu1 %v3206_v15  ;;  %v3221_v0 = vld [vmem:[#allocation13 + $0x4] sm:$0xf0] }
 0x472   : > { %v1415_v44 = vmul.f32 %v3493_v43, %v1413_v36  ;;  %vm1420_vm11 = vweird.f32 %v3493_v43  ;;  %v3495_v36 = vpop.eup %3494 }
 0x473   : > { %vm1421_vm15 = vmor %vm1419_vm13, %vm1420_vm11  ;;  %v1537_v40 = vmul.f32 128.0, %v3495_v36  ;;  %vm1541_vm8 = vweird.f32 %v3495_v36 }
 0x474   : > { %v1416_v46 = vsub.f32 1.0, %v1415_v44 }
 0x475   : > { %1526 = vmatpush.bf16.msrb.mxu1 %v3205_v16 }
 0x476   : > { %v1417_v48 = vmul.f32 %v3493_v43, %v1416_v46  ;;  %v3227_v46 = vld [vmem:[#allocation13 + $0x34] sm:$0xf0] }
 0x478   : > { %v1418_v52 = vadd.f32 %v3493_v43, %v1417_v48  ;;  %v2971_v48 = vor.u32 %v3227_v46, %v2970_v45  ;;  %v2996_v45 = vld [vmem:[#allocation13 + $0x68] sm:$0xf0] }
 0x479   : > { %1527 = vmatpush.bf16.msrb.mxu1 %v3204_v17 }
 0x47a   : > { %v1422_v55 = vsel %vm1421_vm15, %v3493_v43, %v1418_v52  ;;  %v1538_v43 = vsub.f32 1.0, %v1537_v40  ;;  %v2963_v52 = vor.u32 %v3225_v50, %v2962_v49  ;;  %v3228_v50 = vld [vmem:[#allocation13 + $0x44] sm:$0xf] }
 0x47b   : > { %v1427_v57 = vsel %vm1424_vm4, %v1426_v54, %v1422_v55  ;;  %v3223_v54 = vld [vmem:[#allocation13 + $0x14] sm:$0xf0] }
 0x47c   : > { %v1428_v59 = vmul.f32 %v3487_v19, %v1427_v57  ;;  %v1539_v47 = vmul.f32 %v3495_v36, %v1538_v43  ;;  %v2955_v56 = vor.u32 %v3223_v54, %v2954_v53  ;;  %v3232_v43 = vld [vmem:[#allocation13 + $0x64] sm:$0xf] }
 0x47d   : > { %v2999_v46 = vor.u32 %v3232_v43, %v2996_v45 }
 0x47e   : > { %v1429_v63 = vpack.c.bf16 %v1428_v59, %v1428_v59  ;;  %v1540_v51 = vadd.f32 %v3495_v36, %v1539_v47  ;;  %v3230_v47 = vld [vmem:[#allocation13 + $0x54] sm:$0xf] }
 0x480   : > { %2879 = vmatmul.msk.bf16.vlgmr.msra.gmra.mxu0 %vm1195_vm2, %v1429_v63  ;;  %v4509_v55 = vsel %vm1541_vm8, %v3495_v36, %v1540_v51  ;;  %v2946_v63 = vld [vmem:[#allocation13] sm:$0xf]  ;;  %v2980_v51 = vld [vmem:[#allocation13 + $0x48] sm:$0xf0] }
 0x482   : > { %v1362_v1 = vpop.permute.xlu1 %1361 }
 0x483   : > { %v1367_v2 = vsel %vm1224_vm1, %v1362_v1, 0  ;;  %v3218_v1 = vld [vmem:[#allocation11 + $0x30] sm:$0xff] }
 0x484   : > { %1376 = vmatpush.bf16.msra.mxu2 %v1367_v2  ;;  %v2947_v2 = vor.u32 %v3221_v0, %v2946_v63  ;;  %v3226_v0 = vld [vmem:[#allocation13 + $0x34] sm:$0xf] }
 0x487   : > { %2877 = vmatmul.msk.bf16.vlgmr.msra.gmra.mxu2 %vm1195_vm2, %v1360_v3  ;;  %v944_v3 = vld [vmem:[%s810_s11] sm:$0xff] }
 0x488   : > { %1638 = vmatpush.bf16.msrb.mxu2 %v3219_v39 }
 0x48c   : > { %1639 = vmatpush.bf16.msrb.mxu2 %v3218_v1  ;;  %v2972_v1 = vld [vmem:[#allocation13 + $0x38] sm:$0xf0] }
 0x4ed   : > { %v1309_v4 = vpop.f32.mrf.mxu0 }
 0x4ee   : > { %1452 = vrot.lane.b32.xlu2 %v1309_v4, %s4089_s9  ;;  %v4514_v4 = vpack.c.bf16 %v944_v3, %v944_v3  ;;  %v3224_v3 = vld [vmem:[#allocation13 + $0x24] sm:$0xf] }
 0x4f5   : > { %v1311_v5 = vpop.f32.mrf.mxu0 }
 0x4f6   : > { %v3217_v5 = vld [vmem:[#allocation11 + $0x28] sm:$0xff] }
 0x4f7   : > { %1640 = vmatpush.bf16.msrb.mxu2 %v3217_v5  ;;  %v2964_v5 = vld [vmem:[#allocation13 + $0x28] sm:$0xf0] }
 0x4fd   : > { %v1447_v6 = vpop.f32.mrf.mxu0 }
 0x4fe   : > { %1460 = vrot.lane.b32.xlu1 %v1447_v6, %s4088_s1  ;;  %v3216_v6 = vld [vmem:[#allocation11 + $0x20] sm:$0xff] }
 0x4ff   : > { %1641 = vmatpush.bf16.msrb.mxu2 %v3216_v6  ;;  %v2967_v6 = vor.u32 %v3224_v3, %v2964_v5 }
 0x505   : > { %v1449_v7 = vpop.f32.mrf.mxu0 }
 0x506   : > { %v3215_v7 = vld [vmem:[#allocation11 + $0x18] sm:$0xff] }
 0x507   : > { %1642 = vmatpush.bf16.msrb.mxu2 %v3215_v7  ;;  %v3222_v7 = vld [vmem:[#allocation13 + $0x14] sm:$0xf] }
 0x50a   : > { %v1378_v8 = vpop.f32.mrf.mxu2 }
 0x50b   : > { %1456 = vrot.lane.b32.xlu0 %v1378_v8, %s4087_s2  ;;  %v3214_v8 = vld [vmem:[#allocation11 + $0x10] sm:$0xff] }
 0x50c   : > { %1643 = vmatpush.bf16.msrb.mxu2 %v3214_v8  ;;  %v2956_v8 = vld [vmem:[#allocation13 + $0x18] sm:$0xf0] }
 0x512   : > { %v1380_v9 = vpop.f32.mrf.mxu2 }
 0x513   : > { %v3213_v9 = vld [vmem:[#allocation11 + $0x8] sm:$0xff] }
 0x514   : > { %1644 = vmatpush.bf16.msrb.mxu2 %v3213_v9  ;;  %v2959_v9 = vor.u32 %v3222_v7, %v2956_v8 }
 0x518   : > { %1645 = vmatpush.bf16.msrb.mxu2 %v3212_v10  ;;  %v3220_v10 = vld [vmem:[#allocation13 + $0x4] sm:$0xf] }
 0x548   : > { %v1453_v18 = vpop.permute.xlu2 %1452 }
 0x549   : > { %v1463_v19 = vsel %vm1175_vm0, %v4475_v60, %v1453_v18  ;;  %v3002_v60 = vld [vmem:[#allocation13 + $0x70] sm:$0xf] }
 0x54a   : > { %v3003_v26 = vor.u32 %v3235_v32, %v3002_v60 }
 0x54c   : > { %1754 = vmatpush.bf16.msra.mxu3 %v3003_v26  ;;  %v3471_v26 = vld [vmem:[%s4714_s0] ss:$0 sm:$0xff] }
 0x550   : > { %1755 = vmatpush.bf16.msra.mxu3 %v2995_v35 }
 0x554   : > { %1756 = vmatpush.bf16.msra.mxu3 %v2987_v41 }
 0x570   : > { %v1461_v21 = vpop.permute.xlu1 %1460 }
 0x57d   : > { %v1457_v20 = vpop.permute.xlu0 %1456 }
 0x57e   : > { %v1465_v22 = vsel %vm1464_vm6, %v1463_v19, %v1457_v20  ;;  %v3469_v20 = vld [vmem:[%s4712_s15] ss:$0 sm:$0xff] }
 0x57f   : > { %v1467_v23 = vsel %vm1466_vm7, %v1465_v22, %v1461_v21 }
 0x580   : > { %v1468_v24 = vpack.c.bf16 %v1467_v23, %v1467_v23  ;;  %v3470_v23 = vld [vmem:[#allocation10] ss:$0 sm:$0xff] }
 0x582   : > { %1528 = vmatmul.bf16.vlgmr.msrb.gmra.mxu1 %v1468_v24 }
 0x5ff   : > { %v1529_v27 = vpop.f32.mrf.mxu1 }
 0x600   : > { %v1530_v28 = vadd.f32 %v3468_v25, %v1529_v27 }
 0x602   : > { %v1533_v29 = vadd.f32 %v1530_v28, %v4446_v62  ;;  %v2978_v62 = vld [vmem:[#allocation13 + $0x40] sm:$0xf]  ;;  %v4528_v28 = vld [vmem:[%s4713_s18] sm:$0x3] }
 0x603   : > { %v2979_v44 = vor.u32 %v3229_v42, %v2978_v62  ;;  %v3234_v62 = vld [vmem:[#allocation13 + $0x74] sm:$0xf]  ;;  %v3004_v42 = vld [vmem:[#allocation13 + $0x78] sm:$0xf0] }
 0x604   : > { %1534 = vadd.xlane.f32.xlu2 %v1533_v29 }
 0x605   : > { %1757 = vmatpush.bf16.msra.mxu3 %v2979_v44  ;;  %v3007_v44 = vor.u32 %v3234_v62, %v3004_v42 }
 0x607   : > { %v1531_v30 = vpop.f32.mrf.mxu1  ;;  %1767 = vmatpush.bf16.msrb.mxu0 %v3007_v44 }
 0x609   : > { %1758 = vmatpush.bf16.msra.mxu3 %v2971_v48  ;;  %v2988_v48 = vld [vmem:[#allocation13 + $0x58] sm:$0xf0] }
 0x60a   : > { %v2991_v49 = vor.u32 %v3230_v47, %v2988_v48 }
 0x60b   : > { %1768 = vmatpush.bf16.msrb.mxu0 %v2999_v46 }
 0x60d   : > { %1759 = vmatpush.bf16.msra.mxu3 %v2963_v52  ;;  %v2983_v52 = vor.u32 %v3228_v50, %v2980_v51 }
 0x60f   : > { %1769 = vmatpush.bf16.msrb.mxu0 %v2991_v49 }
 0x611   : > { %1760 = vmatpush.bf16.msra.mxu3 %v2955_v56 }
 0x613   : > { %1770 = vmatpush.bf16.msrb.mxu0 %v2983_v52 }
 0x615   : > { %1761 = vmatpush.bf16.msra.mxu3 %v2947_v2  ;;  %v2975_v2 = vor.u32 %v3226_v0, %v2972_v1 }
 0x617   : > { %1771 = vmatpush.bf16.msrb.mxu0 %v2975_v2 }
 0x618   : > { %1762 = vmatmul.bf16.vlgmr.msra.gmra.mxu3 %v4514_v4 }
 0x61b   : > { %1772 = vmatpush.bf16.msrb.mxu0 %v2967_v6 }
 0x61f   : > { %1773 = vmatpush.bf16.msrb.mxu0 %v2959_v9 }
 0x677   : > { %v1535_v57 = vpop.xlane.xlu2 %1534 }
 0x678   : > { %v1543_v58 = vmul.f32 %v4509_v55, %v1535_v57 }
 0x67a   : > { %v1544_v59 = vsub.f32 %v1533_v29, %v1543_v58  ;;  %v1670_v29 = vperm.slane %v4528_v28, 0 }
 0x67c   : > { %v1545_v61 = vmul.f32 %v1544_v59, %v1544_v59 }
 0x67e   : > { %1546 = vadd.xlane.f32.xlu0 %v1545_v61 }
 0x69b   : > { %v1763_v30 = vpop.f32.mrf.mxu3 }
 0x69c   : > { %v1764_v31 = vadd.f32 %v1763_v30, %v1670_v29  ;;  %v1671_v29 = vperm.slane %v4528_v28, 1 }
 0x69e   : > { %v1800_v60 = vpack.c.bf16 %v1764_v31, %v1764_v31 }
 0x6a0   : > { %1869 = vrot.lane.b32.xlu1 %v1800_v60, %s4088_s1  ;;  %v1806_v32 = vsel %vm1175_vm0, %v1800_v60, 0 }
 0x6a1   : > { %1815 = vmatpush.bf16.xpose.msra.mxu1 %v1806_v32 }
 0x6a3   : > { %v1765_v33 = vpop.f32.mrf.mxu3 }
 0x6a8   : > { %1939 = vrot.lane.b32.xlu1 %v1800_v60, %s4087_s2 }
 0x6f1   : > { %v1547_v11 = vpop.xlane.xlu0 %1546 }
 0x6f2   : > { %v1548_v12 = vmul.f32 %v1547_v11, %v4509_v55  ;;  %v2948_v11 = vld [vmem:[#allocation13 + $0x8] sm:$0xf0] }
 0x6f4   : > { %v1549_v13 = vadd.f32 1e-05, %v1548_v12  ;;  %v2951_v12 = vor.u32 %v3220_v10, %v2948_v11 }
 0x6f6   : > { %3496 = vrsqrt.f32 %v1549_v13  ;;  %vm1556_vm10 = vweird.f32 %v1549_v13  ;;  %1774 = vmatpush.bf16.msrb.mxu0 %v2951_v12 }
 0x6f9   : > { %1775 = vmatmul.bf16.vlgmr.msrb.gmra.mxu0 %v4514_v4 }
 0x6fc   : > { %v3497_v14 = vpop.eup %3496 }
 0x6fd   : > { %v1551_v15 = vmul.f32 %v3497_v14, %v1549_v13  ;;  %vm1557_vm9 = vweird.f32 %v3497_v14 }
 0x6fe   : > { %vm1558_vm11 = vmor %vm1556_vm10, %vm1557_vm9 }
 0x6ff   : > { %v1552_v16 = vmul.f32 %v3497_v14, %v1551_v15 }
 0x701   : > { %v1553_v17 = vmul.f32 0.5, %v1552_v16 }
 0x703   : > { %v1554_v18 = vsub.f32 1.5, %v1553_v17 }
 0x705   : > { %v1555_v19 = vmul.f32 %v3497_v14, %v1554_v18 }
 0x707   : > { %v1559_v21 = vsel %vm1558_vm11, %v3497_v14, %v1555_v19 }
 0x708   : > { %v1560_v22 = vmul.f32 %v1559_v21, %v1544_v59 }
 0x70a   : > { %v1564_v24 = vmul.f32 %v3469_v20, %v1560_v22 }
 0x70c   : > { %v4521_v25 = vadd.f32 %v3470_v23, %v1564_v24 }
 0x70e   : > { %v1569_v27 = vpack.c.bf16 %v4521_v25, %v4521_v25 }
 0x710   : > { %1646 = vmatmul.bf16.vlgmr.msrb.gmra.mxu2 %v1569_v27 }
 0x712   : > { %v1870_v38 = vpop.permute.xlu1 %1869 }
 0x713   : > { %v1875_v39 = vsel %vm1175_vm0, %v1870_v38, 0 }
 0x714   : > { %1884 = vmatpush.bf16.xpose.msrb.mxu3 %v1875_v39 }
 0x71a   : > { %v1940_v40 = vpop.permute.xlu1 %1939 }
 0x71b   : > { %v1945_v41 = vsel %vm1175_vm0, %v1940_v40, 0 }
 0x71c   : > { %1954 = vmatpush.bf16.xpose.msrb.mxu1 %v1945_v41 }
 0x776   : > { %v1776_v30 = vpop.f32.mrf.mxu0 }
 0x777   : > { %v1777_v31 = vadd.f32 %v1776_v30, %v1671_v29 }
 0x77e   : > { %v1778_v33 = vpop.f32.mrf.mxu0 }
 0x793   : > { %v1647_v34 = vpop.f32.mrf.mxu2 }
 0x794   : > { %v1648_v35 = vadd.f32 %v3471_v26, %v1647_v34 }
 0x796   : > { %v1799_v36 = vpack.c.bf16 %v1648_v35, %v1648_v35 }
 0x798   : > { %2006 = vrot.lane.b32.xlu2 %v1799_v36, %s4089_s9  ;;  %1866 = vrot.lane.b32.xlu1 %v1799_v36, %s4088_s1 }
 0x799   : > { %3008 = vmatmul.msk.bf16.vlgmr.msra.gmra.mxu1 %vm1175_vm0, %v1799_v36 }
 0x79b   : > { %v1649_v37 = vpop.f32.mrf.mxu2 }
 0x7a0   : > { %2008 = vrot.lane.b32.xlu1 %v1800_v60, %s4089_s9  ;;  %v1801_v60 = vpack.c.bf16 %v1777_v31, %v1777_v31 }
 0x7a2   : > { %v1850_v32 = vsel %vm1224_vm1, %v1801_v60, 0 }
 0x7a3   : > { %1859 = vmatpush.bf16.msra.mxu2 %v1850_v32 }
 0x7a8   : > { %1937 = vrot.lane.b32.xlu1 %v1799_v36, %s4087_s2 }
 0x7f2   : > { %v2007_v59 = vpop.permute.xlu2 %2006 }
 0x80a   : > { %v1867_v53 = vpop.permute.xlu1 %1866 }
 0x80b   : > { %3010 = vmatmul.msk.bf16.vlgmr.msrb.gmra.mxu3 %vm1175_vm0, %v1867_v53 }
 0x812   : > { %v2009_v54 = vpop.permute.xlu1 %2008 }
 0x813   : > { %v2014_v56 = vsel %vm1175_vm0, %v2009_v54, 0 }
 0x814   : > { %2023 = vmatpush.bf16.xpose.msra.mxu3 %v2014_v56 }
 0x816   : > { %v1817_v57 = vpop.f32.mrf.mxu1 }
 0x817   : > { %v1821_v58 = vsel %vm1195_vm2, %v1817_v57, -inf }
 0x818   : > { %1822 = vmax.xlane.f32.xlu1 %v1821_v58 }
 0x81a   : > { %v1938_v61 = vpop.permute.xlu1 %1937 }
 0x81b   : > { %3012 = vmatmul.msk.bf16.vlgmr.msrb.gmra.mxu1 %vm1175_vm0, %v1938_v61  ;;  %3014 = vmatmul.msk.bf16.vlgmr.msra.gmra.mxu3 %vm1175_vm0, %v2007_v59 }
 0x81e   : > { %v1819_v63 = vpop.f32.mrf.mxu1 }
 0x831   : > { %1916 = vrot.lane.b32.xlu1 %v1801_v60, %s4088_s1 }
 0x88b   : > { %v1823_v13 = vpop.xlane.xlu1 %1822 }
 0x88c   : > { %v1824_v14 = vsub.f32 %v1817_v57, %v1823_v13 }
 0x88e   : > { %v1825_v15 = vmul.f32 1.442695, %v1824_v14  ;;  %v1886_v16 = vpop.f32.mrf.mxu3 }
 0x88f   : > { %v1890_v17 = vsel %vm1195_vm2, %v1886_v16, -inf }
 0x890   : > { %3498 = vpow2.f32 %v1825_v15  ;;  %1891 = vmax.xlane.f32.xlu0 %v1890_v17 }
 0x896   : > { %v3499_v18 = vpop.eup %3498  ;;  %v1888_v19 = vpop.f32.mrf.mxu3 }
 0x897   : > { %v1827_v20 = vsel %vm1195_vm2, %v3499_v18, 0.0 }
 0x898   : > { %1828 = vadd.xlane.f32.xlu2 %v1827_v20  ;;  %v1956_v21 = vpop.f32.mrf.mxu1 }
 0x899   : > { %v1960_v22 = vsel %vm1195_vm2, %v1956_v21, -inf }
 0x89a   : > { %1961 = vmax.xlane.f32.xlu0 %v1960_v22 }
 0x89e   : > { %v2025_v23 = vpop.f32.mrf.mxu3 }
 0x89f   : > { %v2029_v4 = vsel %vm1195_vm2, %v2025_v23, -inf }
 0x8a0   : > { %v1958_v24 = vpop.f32.mrf.mxu1 }
 0x8a2   : > { %2030 = vmax.xlane.f32.xlu0 %v2029_v4 }
 0x8a3   : > { %v1917_v61 = vpop.permute.xlu1 %1916 }
 0x8a4   : > { %v1922_v63 = vsel %vm1224_vm1, %v1917_v61, 0 }
 0x8a5   : > { %1931 = vmatpush.bf16.msra.mxu0 %v1922_v63 }
 0x8a6   : > { %v2027_v27 = vpop.f32.mrf.mxu3 }
 0x8b0   : > { %2054 = vrot.lane.b32.xlu2 %v1801_v60, %s4089_s9 }
 0x903   : > { %v1892_v26 = vpop.xlane.xlu0 %1891 }
 0x904   : > { %v1893_v37 = vsub.f32 %v1886_v16, %v1892_v26 }
 0x906   : > { %v1894_v40 = vmul.f32 1.442695, %v1893_v37 }
 0x90b   : > { %v1829_v34 = vpop.xlane.xlu2 %1828 }
 0x90c   : > { %3500 = vrcp.f32 %v1829_v34  ;;  %v1841_v42 = vand.u32 2147483648, %v1829_v34  ;;  %v1839_v44 = vand.u32 2147483647, %v1829_v34  ;;  %vm1835_vm13 = vweird.f32 %v1829_v34 }
 0x90d   : > { %v1962_v35 = vpop.xlane.xlu0 %1961 }
 0x90e   : > { %v1963_v36 = vsub.f32 %v1956_v21, %v1962_v35  ;;  %v1842_v49 = vor.u32 1.1754944e-38, %v1841_v42  ;;  %vm1840_vm15 = vcmp.eq.f32.partialorder %v1839_v44, 8.507059e+37  ;;  %v3243_v44 = vld [vmem:[#allocation14 + $0x38] sm:$0xff] }
 0x90f   : > { %2142 = vmatpush.bf16.msra.mxu1 %v3243_v44 }
 0x910   : > { %v1964_v38 = vmul.f32 1.442695, %v1963_v36 }
 0x912   : > { %v3501_v39 = vpop.eup %3500  ;;  %3502 = vpow2.f32 %v1964_v38 }
 0x913   : > { %v1831_v28 = vmul.f32 %v3501_v39, %v1829_v34  ;;  %vm1836_vm12 = vweird.f32 %v3501_v39  ;;  %3504 = vpow2.f32 %v1894_v40  ;;  %v2055_v0 = vpop.permute.xlu2 %2054 }
 0x914   : > { %vm1837_vm14 = vmor %vm1835_vm13, %vm1836_vm12  ;;  %v2060_v1 = vsel %vm1224_vm1, %v2055_v0, 0 }
 0x915   : > { %v1832_v41 = vsub.f32 1.0, %v1831_v28  ;;  %v2031_v62 = vpop.xlane.xlu0 %2030  ;;  %2069 = vmatpush.bf16.msrb.mxu0 %v2060_v1 }
 0x916   : > { %v2032_v46 = vsub.f32 %v2025_v23, %v2031_v62 }
 0x917   : > { %v1833_v43 = vmul.f32 %v3501_v39, %v1832_v41 }
 0x918   : > { %v4558_v45 = vpop.eup %3502  ;;  %v2033_v52 = vmul.f32 1.442695, %v2032_v46  ;;  %v3242_v46 = vld [vmem:[#allocation14 + $0x30] sm:$0xff] }
 0x919   : > { %v1834_v47 = vadd.f32 %v3501_v39, %v1833_v43  ;;  %v1966_v48 = vsel %vm1195_vm2, %v4558_v45, 0.0  ;;  %v3505_v54 = vpop.eup %3504  ;;  %2143 = vmatpush.bf16.msra.mxu1 %v3242_v46  ;;  %v3068_v46 = vld [vmem:[#allocation19 + $0x28] sm:$0xf0] }
 0x91a   : > { %1967 = vadd.xlane.f32.xlu0 %v1966_v48  ;;  %3506 = vpow2.f32 %v2033_v52  ;;  %v1896_v57 = vsel %vm1195_vm2, %v3505_v54, 0.0 }
 0x91b   : > { %v1838_v50 = vsel %vm1837_vm14, %v3501_v39, %v1834_v47 }
 0x91c   : > { %v1843_v51 = vsel %vm1840_vm15, %v1842_v49, %v1838_v50 }
 0x91d   : > { %v1844_v53 = vmul.f32 %v3499_v18, %v1843_v51 }
 0x91f   : > { %v1845_v56 = vpack.c.bf16 %v1844_v53, %v1844_v53  ;;  %v3240_v53 = vld [vmem:[#allocation14 + $0x20] sm:$0xff] }
 0x920   : > { %v4564_v58 = vpop.eup %3506 }
 0x921   : > { %3009 = vmatmul.msk.bf16.vlgmr.msra.gmra.mxu2 %vm1195_vm2, %v1845_v56  ;;  %v2035_v59 = vsel %vm1195_vm2, %v4564_v58, 0.0  ;;  %v3238_v56 = vld [vmem:[#allocation14 + $0x10] sm:$0xff] }
 0x922   : > { %1897 = vadd.xlane.f32.xlu0 %v1896_v57  ;;  %v3237_v57 = vld [vmem:[#allocation14 + $0x8] sm:$0xff] }
 0x92a   : > { %2036 = vadd.xlane.f32.xlu0 %v2035_v59 }
 0x93e   : > { %1985 = vrot.lane.b32.xlu0 %v1801_v60, %s4087_s2 }
 0x98d   : > { %v1968_v2 = vpop.xlane.xlu0 %1967 }
 0x98e   : > { %3508 = vrcp.f32 %v1968_v2  ;;  %v1980_v23 = vand.u32 2147483648, %v1968_v2  ;;  %vm1974_vm10 = vweird.f32 %v1968_v2  ;;  %v1978_v4 = vand.u32 2147483647, %v1968_v2 }
 0x990   : > { %v1981_v32 = vor.u32 1.1754944e-38, %v1980_v23  ;;  %vm1979_vm12 = vcmp.eq.f32.partialorder %v1978_v4, 8.507059e+37  ;;  %v3100_v23 = vld [vmem:[#allocation19 + $0x68] sm:$0xf0]  ;;  %v3090_v4 = vld [vmem:[#allocation19 + $0x50] sm:$0xf] }
 0x994   : > { %v3509_v5 = vpop.eup %3508 }
 0x995   : > { %v1898_v3 = vpop.xlane.xlu0 %1897  ;;  %v1970_v6 = vmul.f32 %v3509_v5, %v1968_v2  ;;  %vm1975_vm5 = vweird.f32 %v3509_v5 }
 0x996   : > { %3510 = vrcp.f32 %v1898_v3  ;;  %v1910_v12 = vand.u32 2147483648, %v1898_v3  ;;  %v1908_v15 = vand.u32 2147483647, %v1898_v3  ;;  %vm1904_vm4 = vweird.f32 %v1898_v3  ;;  %vm1976_vm11 = vmor %vm1974_vm10, %vm1975_vm5 }
 0x997   : > { %v1971_v8 = vsub.f32 1.0, %v1970_v6 }
 0x998   : > { %v1911_v18 = vor.u32 1.1754944e-38, %v1910_v12  ;;  %vm1909_vm9 = vcmp.eq.f32.partialorder %v1908_v15, 8.507059e+37  ;;  %v3258_v12 = vld [vmem:[#allocation19 + $0x74] sm:$0xf] }
 0x999   : > { %v1972_v13 = vmul.f32 %v3509_v5, %v1971_v8 }
 0x99b   : > { %v1973_v20 = vadd.f32 %v3509_v5, %v1972_v13 }
 0x99c   : > { %v3511_v7 = vpop.eup %3510 }
 0x99d   : > { %v1900_v9 = vmul.f32 %v3511_v7, %v1898_v3  ;;  %v2037_v10 = vpop.xlane.xlu0 %2036  ;;  %vm1905_vm3 = vweird.f32 %v3511_v7  ;;  %v1977_v30 = vsel %vm1976_vm11, %v3509_v5, %v1973_v20  ;;  %v3472_v5 = vld [vmem:[#allocation16] ss:$0 sm:$0xff]  ;;  %v3257_v20 = vld [vmem:[#allocation19 + $0x64] sm:$0xf0] }
 0x99e   : > { %3512 = vrcp.f32 %v2037_v10  ;;  %vm1906_vm8 = vmor %vm1904_vm4, %vm1905_vm3  ;;  %v1982_v26 = vsel %vm1979_vm12, %v1981_v32, %v1977_v30  ;;  %v2049_v34 = vand.u32 2147483648, %v2037_v10  ;;  %vm2043_vm14 = vweird.f32 %v2037_v10  ;;  %v3082_v32 = vld [vmem:[#allocation19 + $0x40] sm:$0xf] }
 0x99f   : > { %v1901_v11 = vsub.f32 1.0, %v1900_v9  ;;  %v2047_v36 = vand.u32 2147483647, %v2037_v10  ;;  %v1983_v37 = vmul.f32 %v4558_v45, %v1982_v26  ;;  %v3241_v45 = vld [vmem:[#allocation14 + $0x28] sm:$0xff] }
 0x9a0   : > { %v2050_v39 = vor.u32 1.1754944e-38, %v2049_v34  ;;  %2144 = vmatpush.bf16.msra.mxu1 %v3241_v45  ;;  %v3252_v26 = vld [vmem:[#allocation19 + $0x44] sm:$0xf] }
 0x9a1   : > { %v1902_v14 = vmul.f32 %v3511_v7, %v1901_v11  ;;  %vm2048_vm3 = vcmp.eq.f32.partialorder %v2047_v36, 8.507059e+37  ;;  %v1984_v62 = vpack.c.bf16 %v1983_v37, %v1983_v37  ;;  %v3259_v11 = vld [vmem:[#allocation19 + $0x74] sm:$0xf0]  ;;  %v3074_v37 = vld [vmem:[#allocation19 + $0x30] sm:$0xf] }
 0x9a3   : > { %v1903_v16 = vadd.f32 %v3511_v7, %v1902_v14  ;;  %v3108_v14 = vld [vmem:[#allocation19 + $0x78] sm:$0xf0] }
 0x9a4   : > { %v3513_v17 = vpop.eup %3512  ;;  %v4571_v19 = vpop.f32.mrf.mxu2  ;;  %2145 = vmatpush.bf16.msra.mxu1 %v3240_v53  ;;  %v3111_v15 = vor.u32 %v3258_v12, %v3108_v14  ;;  %v3245_v53 = vld [vmem:[#allocation19 + $0x4] sm:$0xf0]  ;;  %v3263_v12 = vld [vmem:[#allocation22 + $0x18] sm:$0xff] }
 0x9a5   : > { %v1907_v21 = vsel %vm1906_vm8, %v3511_v7, %v1903_v16  ;;  %v2039_v22 = vmul.f32 %v3513_v17, %v2037_v10  ;;  %vm2044_vm13 = vweird.f32 %v3513_v17  ;;  %v3106_v10 = vld [vmem:[#allocation19 + $0x70] sm:$0xf] }
 0x9a6   : > { %v1912_v24 = vsel %vm1909_vm9, %v1911_v18, %v1907_v21  ;;  %vm2045_vm15 = vmor %vm2043_vm14, %vm2044_vm13  ;;  %v3107_v13 = vor.u32 %v3259_v11, %v3106_v10  ;;  %2300 = vmatpush.bf16.msrb.mxu3 %v3111_v15  ;;  %v3256_v21 = vld [vmem:[#allocation19 + $0x64] sm:$0xf] }
 0x9a7   : > { %v1913_v27 = vmul.f32 %v3505_v54, %v1912_v24  ;;  %v2040_v29 = vsub.f32 1.0, %v2039_v22  ;;  %v3239_v54 = vld [vmem:[#allocation14 + $0x18] sm:$0xff]  ;;  %v3103_v24 = vor.u32 %v3256_v21, %v3100_v23  ;;  %v3474_v23 = vld [vmem:[#allocation17] ss:$0 sm:$0xff] }
 0x9a8   : > { %2146 = vmatpush.bf16.msra.mxu1 %v3239_v54 }
 0x9a9   : > { %v2041_v31 = vmul.f32 %v3513_v17, %v2040_v29  ;;  %v1914_v60 = vpack.c.bf16 %v1913_v27, %v1913_v27  ;;  %v3255_v27 = vld [vmem:[#allocation19 + $0x54] sm:$0xf0]  ;;  %v3254_v29 = vld [vmem:[#allocation19 + $0x54] sm:$0xf] }
 0x9aa   : > { %2301 = vmatpush.bf16.msrb.mxu3 %v3103_v24  ;;  %v3091_v30 = vor.u32 %v3255_v27, %v3090_v4 }
 0x9ab   : > { %v2042_v33 = vadd.f32 %v3513_v17, %v2041_v31  ;;  %3011 = vmatmul.msk.bf16.vlgmr.msra.gmra.mxu0 %vm1195_vm2, %v1914_v60  ;;  %v3092_v31 = vld [vmem:[#allocation19 + $0x58] sm:$0xf0] }
 0x9ac   : > { %v1863_v35 = vpop.f32.mrf.mxu2  ;;  %2147 = vmatpush.bf16.msra.mxu1 %v3238_v56  ;;  %v3095_v60 = vor.u32 %v3254_v29, %v3092_v31  ;;  %v3244_v56 = vld [vmem:[#allocation19 + $0x4] sm:$0xf]  ;;  %v3261_v29 = vld [vmem:[#allocation22 + $0x8] sm:$0xff] }
 0x9ad   : > { %v2046_v38 = vsel %vm2045_vm15, %v3513_v17, %v2042_v33  ;;  %v3253_v33 = vld [vmem:[#allocation19 + $0x44] sm:$0xf0]  ;;  %v3084_v35 = vld [vmem:[#allocation19 + $0x48] sm:$0xf0] }
 0x9ae   : > { %v2051_v41 = vsel %vm2048_vm3, %v2050_v39, %v2046_v38  ;;  %2302 = vmatpush.bf16.msrb.mxu3 %v3095_v60  ;;  %v3083_v34 = vor.u32 %v3253_v33, %v3082_v32  ;;  %v3087_v36 = vor.u32 %v3252_v26, %v3084_v35  ;;  %v3251_v38 = vld [vmem:[#allocation19 + $0x34] sm:$0xf0]  ;;  %v3250_v39 = vld [vmem:[#allocation19 + $0x34] sm:$0xf]  ;;  %v3260_v31 = vld [vmem:[#allocation22] sm:$0xff] }
 0x9af   : > { %v2052_v42 = vmul.f32 %v4564_v58, %v2051_v41  ;;  %v3236_v58 = vld [vmem:[#allocation14] sm:$0xff] }
 0x9b0   : > { %v1986_v28 = vpop.permute.xlu0 %1985  ;;  %2148 = vmatpush.bf16.msra.mxu1 %v3237_v57  ;;  %v3052_v57 = vld [vmem:[#allocation19 + $0x8] sm:$0xf0]  ;;  %v3268_v60 = vld [vmem:[#allocation22 + $0x40] sm:$0xff]  ;;  %v2201_v32 = vld [vmem:[#allocation20] sm:$0x3] }
 0x9b1   : > { %v1991_v40 = vsel %vm1224_vm1, %v1986_v28, 0  ;;  %v2053_v43 = vpack.c.bf16 %v2052_v42, %v2052_v42  ;;  %v3075_v28 = vor.u32 %v3251_v38, %v3074_v37  ;;  %v3249_v42 = vld [vmem:[#allocation19 + $0x24] sm:$0xf0]  ;;  %v2203_v33 = vperm.slane %v2201_v32, 0 }
 0x9b2   : > { %2000 = vmatpush.bf16.msrb.mxu2 %v1991_v40  ;;  %2303 = vmatpush.bf16.msrb.mxu3 %v3087_v36  ;;  %v3076_v40 = vld [vmem:[#allocation19 + $0x38] sm:$0xf0]  ;;  %v2204_v26 = vperm.slane %v2201_v32, 1 }
 0x9b3   : > { %v3079_v41 = vor.u32 %v3250_v39, %v3076_v40 }
 0x9b4   : > { %2149 = vmatpush.bf16.msra.mxu1 %v3236_v58 }
 0x9b5   : > { %3013 = vmatmul.msk.bf16.vlgmr.msrb.gmra.mxu2 %vm1195_vm2, %v1984_v62  ;;  %v3066_v62 = vld [vmem:[#allocation19 + $0x20] sm:$0xf] }
 0x9b6   : > { %2287 = vmatpush.bf16.msra.mxu2 %v3107_v13  ;;  %2304 = vmatpush.bf16.msrb.mxu3 %v3079_v41  ;;  %v3067_v44 = vor.u32 %v3249_v42, %v3066_v62  ;;  %v3271_v13 = vld [vmem:[#allocation22 + $0x58] sm:$0xff]  ;;  %v3475_v62 = vld [vmem:[#allocation23] ss:$0 sm:$0xff] }
 0x9bb   : > { %3015 = vmatmul.msk.bf16.vlgmr.msrb.gmra.mxu0 %vm1195_vm2, %v2053_v43  ;;  %v3248_v43 = vld [vmem:[#allocation19 + $0x24] sm:$0xf] }
 0x9bc   : > { %v3071_v45 = vor.u32 %v3248_v43, %v3068_v46 }
 0x9be   : > { %2305 = vmatpush.bf16.msrb.mxu3 %v3071_v45 }
 0xa28   : > { %v1933_v47 = vpop.f32.mrf.mxu0 }
 0xa29   : > { %2076 = vrot.lane.b32.xlu1 %v1933_v47, %s4089_s9  ;;  %v3058_v47 = vld [vmem:[#allocation19 + $0x10] sm:$0xf] }
 0xa30   : > { %v1935_v48 = vpop.f32.mrf.mxu0 }
 0xa31   : > { %v3247_v48 = vld [vmem:[#allocation19 + $0x14] sm:$0xf0] }
 0xa38   : > { %v2002_v49 = vpop.f32.mrf.mxu2  ;;  %v2071_v50 = vpop.f32.mrf.mxu0 }
 0xa39   : > { %2084 = vrot.lane.b32.xlu1 %v2071_v50, %s4088_s1  ;;  %2080 = vrot.lane.b32.xlu0 %v2002_v49, %s4087_s2  ;;  %v3246_v49 = vld [vmem:[#allocation19 + $0x14] sm:$0xf]  ;;  %v3059_v50 = vor.u32 %v3247_v48, %v3058_v47  ;;  %s4715_s2 = sld [smem:[#allocation52_spill]]  ;;  %s3177_s1 = sshll.u32 %s4230_s5, 3 }
 0xa3a   : > { %s2518_s15 = scalar_lea.hbm %s4717_s7, %s3177_s1  ;;  %s2508_s5 = scalar_lea.sflag [#allocation4], %s4399_s16 }
 0xa3b   : > { %s2522_s18 = sshll.u32 %s2518_s15, 4  ;;  %s2523_s18 = int_to_ptr.hbm [resolvable:$true] %s2522_s18 }
 0xa3c   : > { %s3982_s19 = sshra.s32 %s2523_s18, 4  ;;  %s3983_s19 = int_to_ptr.hbm [resolvable:$true] %s3982_s19 }
 0xa3d   : > { %s3984_s11 = scalar_lea.hbm %s3983_s19, 8  ;;  %p3989_p7 = scmp.lt.s32.totalorder %s3983_s19, %s4717_s7 }
 0xa3e   : > { %p3985_p1 = scmp.ne.s32.totalorder %s3983_s19, %s3984_s11  ;;  %p3990_p9 = scmp.lt.s32.totalorder %s3988_s14, %s3984_s11 }
 0xa40   : > { %v2004_v51 = vpop.f32.mrf.mxu2  ;;  %v2073_v52 = vpop.f32.mrf.mxu0  ;;  %p3986_p3 = pnand %p3985_p1, %p4348_p0  ;;  %p3991_p8 = por %p3990_p9, %p3989_p7 }
 0xa41   : > { %v3060_v51 = vld [vmem:[#allocation19 + $0x18] sm:$0xf0]  ;;  %v3050_v52 = vld [vmem:[#allocation19] sm:$0xf] }
 0xa42   : > { %v3063_v54 = vor.u32 %v3246_v49, %v3060_v51  ;;  %v3051_v58 = vor.u32 %v3245_v53, %v3050_v52  ;;  %p3987_p13 = pneg %p3986_p3 }
 0xa44   : > { %2306 = vmatpush.bf16.msrb.mxu3 %v3063_v54  ;;  %p3992_p10 = pnand %p3991_p8, %p3987_p13 }
 0xa9b   : > { %v2077_v59 = vpop.permute.xlu1 %2076 }
 0xa9c   : > { %v2087_v61 = vsel %vm1175_vm0, %v4571_v19, %v2077_v59  ;;  %v3055_v59 = vor.u32 %v3244_v56, %v3052_v57 }
 0xa9e   : > { %2307 = vmatpush.bf16.msrb.mxu3 %v3055_v59 }
 0xaab   : > { %v2085_v63 = vpop.permute.xlu1 %2084  ;;  %v2081_v0 = vpop.permute.xlu0 %2080 }
 0xaac   : > { %v2088_v1 = vsel %vm1464_vm6, %v2087_v61, %v2081_v0  ;;  %v3267_v61 = vld [vmem:[#allocation22 + $0x38] sm:$0xff] }
 0xaad   : > { %v2089_v2 = vsel %vm1466_vm7, %v2088_v1, %v2085_v63  ;;  %v3275_v63 = vld [vmem:[#allocation22 + $0x78] sm:$0xff]  ;;  %2449 = vmatpush.bf16.msra.mxu0 %v3267_v61 }
 0xaae   : > { %v2090_v3 = vpack.c.bf16 %v2089_v2, %v2089_v2  ;;  %2462 = vmatpush.bf16.msrb.mxu1 %v3275_v63  ;;  %v3266_v2 = vld [vmem:[#allocation22 + $0x30] sm:$0xff] }
 0xab0   : > { %2150 = vmatmul.bf16.vlgmr.msra.gmra.mxu1 %v2090_v3  ;;  %v3274_v3 = vld [vmem:[#allocation22 + $0x70] sm:$0xff] }
 0xab1   : > { %2450 = vmatpush.bf16.msra.mxu0 %v3266_v2 }
 0xab2   : > { %2463 = vmatpush.bf16.msrb.mxu1 %v3274_v3  ;;  %v3477_v3 = vld [vmem:[#allocation25] ss:$0 sm:$0xff] }
 0xb2d   : > { %v2151_v6 = vpop.f32.mrf.mxu1 }
 0xb2e   : > { %v2152_v7 = vadd.f32 %v3472_v5, %v2151_v6  ;;  %v3265_v6 = vld [vmem:[#allocation22 + $0x28] sm:$0xff] }
 0xb2f   : > { %2451 = vmatpush.bf16.msra.mxu0 %v3265_v6 }
 0xb30   : > { %v2155_v8 = vadd.f32 %v2152_v7, %v4521_v25  ;;  %v3098_v25 = vld [vmem:[#allocation19 + $0x60] sm:$0xf]  ;;  %v3273_v7 = vld [vmem:[#allocation22 + $0x68] sm:$0xff] }
 0xb31   : > { %v3099_v22 = vor.u32 %v3257_v20, %v3098_v25  ;;  %2464 = vmatpush.bf16.msrb.mxu1 %v3273_v7  ;;  %v3473_v20 = vld [vmem:[%s4715_s2] ss:$0 sm:$0xff] }
 0xb32   : > { %2156 = vadd.xlane.f32.xlu0 %v2155_v8 }
 0xb33   : > { %2288 = vmatpush.bf16.msra.mxu2 %v3099_v22 }
 0xb35   : > { %v2153_v9 = vpop.f32.mrf.mxu1 }
 0xb36   : > { %v3272_v9 = vld [vmem:[#allocation22 + $0x60] sm:$0xff] }
 0xb37   : > { %2289 = vmatpush.bf16.msra.mxu2 %v3091_v30  ;;  %2465 = vmatpush.bf16.msrb.mxu1 %v3272_v9  ;;  %v3269_v30 = vld [vmem:[#allocation22 + $0x48] sm:$0xff] }
 0xb3b   : > { %2290 = vmatpush.bf16.msra.mxu2 %v3083_v34  ;;  %2466 = vmatpush.bf16.msrb.mxu1 %v3271_v13 }
 0xb3f   : > { %2291 = vmatpush.bf16.msra.mxu2 %v3075_v28 }
 0xb43   : > { %2292 = vmatpush.bf16.msra.mxu2 %v3067_v44 }
 0xb47   : > { %2293 = vmatpush.bf16.msra.mxu2 %v3059_v50 }
 0xb4b   : > { %2294 = vmatpush.bf16.msra.mxu2 %v3051_v58 }
 0xba5   : > { %v2157_v16 = vpop.xlane.xlu0 %2156 }
 0xba6   : > { %v2158_v17 = vmul.f32 %v2157_v16, %v4509_v55  ;;  %v3262_v16 = vld [vmem:[#allocation22 + $0x10] sm:$0xff] }
 0xba8   : > { %v4588_v18 = vsub.f32 %v2155_v8, %v2158_v17  ;;  %v3264_v8 = vld [vmem:[#allocation22 + $0x20] sm:$0xff]  ;;  %v3270_v17 = vld [vmem:[#allocation22 + $0x50] sm:$0xff] }
 0xba9   : > { %2452 = vmatpush.bf16.msra.mxu0 %v3264_v8  ;;  %2467 = vmatpush.bf16.msrb.mxu1 %v3270_v17 }
 0xbaa   : > { %v2160_v19 = vmul.f32 %v4588_v18, %v4588_v18 }
 0xbac   : > { %2161 = vadd.xlane.f32.xlu1 %v2160_v19 }
 0xbad   : > { %2453 = vmatpush.bf16.msra.mxu0 %v3263_v12  ;;  %2468 = vmatpush.bf16.msrb.mxu1 %v3269_v30 }
 0xbb1   : > { %2454 = vmatpush.bf16.msra.mxu0 %v3262_v16  ;;  %2469 = vmatpush.bf16.msrb.mxu1 %v3268_v60 }
 0xbb5   : > { %2455 = vmatpush.bf16.msra.mxu0 %v3261_v29 }
 0xbb9   : > { %2456 = vmatpush.bf16.msra.mxu0 %v3260_v31 }
 0xc1f   : > { %v2162_v0 = vpop.xlane.xlu1 %2161 }
 0xc20   : > { %v2163_v1 = vmul.f32 %v2162_v0, %v4509_v55 }
 0xc22   : > { %v2164_v5 = vadd.f32 1e-05, %v2163_v1  ;;  %v3476_v1 = vld [vmem:[%s4716_s4] ss:$0 sm:$0xff] }
 0xc24   : > { %3514 = vrsqrt.f32 %v2164_v5  ;;  %vm2171_vm1 = vweird.f32 %v2164_v5 }
 0xc2a   : > { %v3515_v10 = vpop.eup %3514 }
 0xc2b   : > { %v2166_v11 = vmul.f32 %v3515_v10, %v2164_v5  ;;  %vm2172_vm0 = vweird.f32 %v3515_v10 }
 0xc2c   : > { %vm2173_vm2 = vmor %vm2171_vm1, %vm2172_vm0 }
 0xc2d   : > { %v2167_v14 = vmul.f32 %v3515_v10, %v2166_v11 }
 0xc2f   : > { %v2168_v15 = vmul.f32 0.5, %v2167_v14 }
 0xc31   : > { %v2169_v19 = vsub.f32 1.5, %v2168_v15 }
 0xc33   : > { %v2170_v25 = vmul.f32 %v3515_v10, %v2169_v19 }
 0xc35   : > { %v2174_v21 = vsel %vm2173_vm2, %v3515_v10, %v2170_v25 }
 0xc36   : > { %v2175_v22 = vmul.f32 %v2174_v21, %v4588_v18 }
 0xc38   : > { %v2179_v24 = vmul.f32 %v3473_v20, %v2175_v22 }
 0xc3a   : > { %v2183_v4 = vadd.f32 %v3474_v23, %v2179_v24 }
 0xc3c   : > { %v2184_v27 = vpack.c.bf16 %v2183_v4, %v2183_v4 }
 0xc3e   : > { %2295 = vmatmul.bf16.vlgmr.msra.gmra.mxu2 %v2184_v27  ;;  %2308 = vmatmul.bf16.vlgmr.msrb.gmra.mxu3 %v2184_v27 }
 0xcc1   : > { %v2296_v34 = vpop.f32.mrf.mxu2  ;;  %v2309_v35 = vpop.f32.mrf.mxu3 }
 0xcc2   : > { %v2297_v18 = vadd.f32 %v2296_v34, %v2203_v33  ;;  %v2310_v36 = vadd.f32 %v2309_v35, %v2204_v26 }
 0xcc4   : > { %v2313_v37 = vmax.f32 %v2297_v18, 0.0  ;;  %v2314_v38 = vmax.f32 %v2310_v36, 0.0 }
 0xcc6   : > { %v2315_v39 = vpack.c.bf16 %v2313_v37, %v2313_v37  ;;  %v2316_v28 = vpack.c.bf16 %v2314_v38, %v2314_v38 }
 0xcc8   : > { %2457 = vmatmul.bf16.vlgmr.msra.gmra.mxu0 %v2315_v39  ;;  %2470 = vmatmul.bf16.vlgmr.msrb.gmra.mxu1 %v2316_v28 }
 0xcc9   : > { %v2298_v40 = vpop.f32.mrf.mxu2  ;;  %v2311_v41 = vpop.f32.mrf.mxu3 }
 0xd45   : > { %v2458_v42 = vpop.f32.mrf.mxu0  ;;  %v2471_v43 = vpop.f32.mrf.mxu1 }
 0xd46   : > { %v2459_v44 = vadd.f32 %v3475_v62, %v2458_v42 }
 0xd48   : > { %v2472_v46 = vadd.f32 %v2471_v43, %v2459_v44 }
 0xd4a   : > { %v2475_v45 = vadd.f32 %v2472_v46, %v2183_v4 }
 0xd4c   : > { %2476 = vadd.xlane.f32.xlu2 %v2475_v45 }
 0xd4d   : > { %v2460_v47 = vpop.f32.mrf.mxu0  ;;  %v2473_v48 = vpop.f32.mrf.mxu1 }
 0xdbf   : > { %v2477_v49 = vpop.xlane.xlu2 %2476 }
 0xdc0   : > { %v2478_v50 = vmul.f32 %v2477_v49, %v4509_v55 }
 0xdc2   : > { %v2479_v51 = vsub.f32 %v2475_v45, %v2478_v50 }
 0xdc4   : > { %v2480_v52 = vmul.f32 %v2479_v51, %v2479_v51 }
 0xdc6   : > { %2481 = vadd.xlane.f32.xlu0 %v2480_v52 }
 0xe39   : > { %v2482_v53 = vpop.xlane.xlu0 %2481 }
 0xe3a   : > { %v2483_v54 = vmul.f32 %v2482_v53, %v4509_v55 }
 0xe3c   : > { %v2484_v56 = vadd.f32 1e-05, %v2483_v54 }
 0xe3e   : > { %3516 = vrsqrt.f32 %v2484_v56  ;;  %vm2491_vm7 = vweird.f32 %v2484_v56 }
 0xe44   : > { %v3517_v57 = vpop.eup %3516 }
 0xe45   : > { %v2486_v58 = vmul.f32 %v3517_v57, %v2484_v56  ;;  %vm2492_vm6 = vweird.f32 %v3517_v57 }
 0xe46   : > { %vm2493_vm4 = vmor %vm2491_vm7, %vm2492_vm6 }
 0xe47   : > { %v2487_v59 = vmul.f32 %v3517_v57, %v2486_v58 }
 0xe49   : > { %v2488_v61 = vmul.f32 0.5, %v2487_v59 }
 0xe4b   : > { %v2489_v63 = vsub.f32 1.5, %v2488_v61 }
 0xe4d   : > { %v2490_v0 = vmul.f32 %v3517_v57, %v2489_v63 }
 0xe4f   : > { %v2494_v55 = vsel %vm2493_vm4, %v3517_v57, %v2490_v0 }
 0xe50   : > { %v2495_v2 = vmul.f32 %v2494_v55, %v2479_v51 }
 0xe52   : > { %v2500_v5 = vmul.f32 %v3476_v1, %v2495_v2 }
 0xe54   : > { %v2505_v6 = vadd.f32 %v3477_v3, %v2500_v5 }
 0xe56   : > { %2506 = vst [vmem:[%s941_s24] sm:$0xff] %v2505_v6 }
 0xe57   : > { %3995 = shalt.err (!%p3992_p10)
}
 0xe58   : > { %3332 = dma.vmem_to_hbm [thread:$0]  (%p4348_p0), %s2521_s27, 128, %s2523_s18, %s2508_s5  }
 0xe59 PF: > { %s2534_s16 = sand.u32 1, %s4054_s3   ;;  %p4718_p12 = scmp.ge.s32.totalorder %s4066_s30, 2 }
 0xe5a   : > { %s2535_s1 = scalar_lea.sflag [#allocation4], %s2534_s16 }
 0xe5b   : > { %p3382_p5 = pnand %p4718_p12, %p4354_p6 }
 0xe5d   : > { %p3383_p11 = pneg %p3382_p5 }
 0xe5f   : > { %4049 = dma.done.wait (%p3383_p11), %s2535_s1, 128  }
 0xe60   : > { %4051 = vsyncadd (%p3383_p11), %s2535_s1, 4294967168  ;;  %p44_p2 = scmp.ge.s32.totalorder %s4324_s23, 4   ;;  %s4719_s3 = smov %s4058_s28 }
 0xe61   : > { %s4720_s28 = smov %s4062_s29  ;;  %s4721_s29 = smov %s4336_s26 }
 0xe62   : > { %s4722_s30 = smov %s4324_s23  ;;  %46 = sbr.rel (!%p44_p2) target bundleno = 36 (0x24), region = 218 }
 0xe67   :  { %2541 = vsyncpa [#allocation3], 1 }
 0xe68   :  { %2543 = vsyncpa [#allocation3 + $0x1], 1 }
 0xe69   :  { %2544 = vsyncpa [#allocation6], 1 }
 0xe6a   :  { %2546 = vsyncpa [#allocation6 + $0x1], 1 }
 0xe6b   :  { %2547 = vsyncpa [#allocation9], 1 }
 0xe6c   :  { %2548 = vsyncpa [#allocation12], 1 }
 0xe6d   :  { %2549 = vsyncpa [#allocation15], 1 }
 0xe6e   :  { %2550 = vsyncpa [#allocation18], 1 }
 0xe6f   :  { %2551 = vsyncpa [#allocation21], 1 }
 0xe70   :  { %2552 = vsyncpa [#allocation24], 1 }
 0xe71   :  { %2553 = vsyncpa [#allocation4], 1 }
 0xe72   :  { %2555 = vsyncpa [#allocation4 + $0x1], 1 }

</bundles_post_ra>
